<compile_context>
chip_gen: v5e
topology: v5e:2x2
jax: 0.10.0
libtpu: 0.0.40
codegen_flags: <defaults>
</compile_context>

<pallas_src>
import math
from functools import partial

import jax
import jax.numpy as jnp
from jax import lax
from jax.experimental import pallas as pl
from jax.experimental.pallas import tpu as pltpu


OPAD = 128  # lane-dense padding for the final (odim=2) output


# ----------------------------- fused Pallas kernel --------------------------

def make_fused_kernel(n_layers, kernel_size, T):
    """Build the fused forward kernel for a fixed layer count / kernel size."""
    K = kernel_size
    pad = K // 2

    def kernel(*refs):
        # refs: x, pos, (w, b, gamma, beta) * n_layers, lin_w, lin_b, out
        x_ref, pos_ref = refs[0], refs[1]
        layer_refs = refs[2:2 + 4 * n_layers]
        lin_w_ref = refs[2 + 4 * n_layers]
        lin_b_ref = refs[3 + 4 * n_layers]
        o_ref = refs[4 + 4 * n_layers]

        # positional add (alpha-scaled embeddings precomputed in the wrapper)
        x = x_ref[0] + pos_ref[0]                                  # (T, Cin0)

        for l in range(n_layers):
            w_ref, b_ref, g_ref, be_ref = layer_refs[4 * l:4 * l + 4]
            cin = x.shape[1]

            # in-kernel SAME padding along time
            zpad = jnp.zeros((pad, cin), jnp.float32)
            xp = jnp.concatenate([zpad, x, zpad], axis=0)          # (T+K-1, Cin)

            # im2col: (T, K*Cin) slab, one MXU matmul against (K*Cin, Cout)
            slab = jnp.concatenate(
                [xp[k:k + T, :] for k in range(K)], axis=1)        # (T, K*Cin)
            acc = jnp.dot(slab, w_ref[...],
                          preferred_element_type=jnp.float32) + b_ref[...]

            # ReLU
            acc = jnp.maximum(acc, 0.0)

            # LayerNorm over the channel (lane) axis, eps = 1e-12
            # single-pass stats: mean and mean-of-squares
            c = acc.shape[1]
            s1 = jnp.sum(acc, axis=-1, keepdims=True)
            s2 = jnp.sum(acc * acc, axis=-1, keepdims=True)
            mean = s1 * (1.0 / c)
            var = jnp.maximum(s2 * (1.0 / c) - mean * mean, 0.0)
            x = (acc - mean) * lax.rsqrt(var + 1e-12) * g_ref[...] + be_ref[...]

            # Dropout is identity in eval mode.

        # final Linear, lane-padded to OPAD columns (lane-dense store)
        out = jnp.dot(x, lin_w_ref[...],
                      preferred_element_type=jnp.float32) + lin_b_ref[...]
        o_ref[0] = out.astype(o_ref.dtype)

    return kernel


# ------------------- positional embedding (parameter setup / glue) ----------

def sinusoidal_table(num_embeddings, embedding_dim, padding_idx=0):
    """fairseq-style sinusoidal positional embedding table."""
    half_dim = embedding_dim // 2
    emb = math.log(10000.0) / (half_dim - 1)
    emb = jnp.exp(jnp.arange(half_dim, dtype=jnp.float32) * -emb)
    emb = jnp.arange(num_embeddings, dtype=jnp.float32)[:, None] * emb[None, :]
    emb = jnp.concatenate([jnp.sin(emb), jnp.cos(emb)], axis=1)
    if embedding_dim % 2 == 1:
        emb = jnp.concatenate(
            [emb, jnp.zeros((num_embeddings, 1), jnp.float32)], axis=1)
    emb = emb.at[padding_idx].set(0.0)
    return emb


def positional_embeddings(xs, table, padding_idx=0):
    """make_positions + table lookup, on xs[..., 0] as the 'token' signal."""
    # TODO(synk): data-dependent position gather stays as XLA glue (no clean
    # in-kernel equivalent without a VMEM gather).
    tokens = xs[..., 0]
    mask = (tokens != padding_idx).astype(jnp.int32)
    positions = jnp.cumsum(mask, axis=1) * mask + padding_idx
    return table[positions]


# ----------------------------- model wrapper --------------------------------

def init_params(key, idim, n_layers, n_chans, odim, kernel_size):
    params = {"layers": []}
    for idx in range(n_layers):
        in_chans = idim if idx == 0 else n_chans
        key, kw, kb, kg, kbe = jax.random.split(key, 5)
        w = jax.random.normal(kw, (kernel_size, in_chans, n_chans),
                              jnp.float32) * 0.1      # (K, Cin, Cout)
        b = jax.random.normal(kb, (1, n_chans), jnp.float32) * 0.1
        g = 1.0 + 0.1 * jax.random.normal(kg, (1, n_chans), jnp.float32)
        beta = 0.1 * jax.random.normal(kbe, (1, n_chans), jnp.float32)
        params["layers"].append((w, b, g, beta))
    key, kw, kb = jax.random.split(key, 3)
    params["lin_w"] = jax.random.normal(kw, (n_chans, odim), jnp.float32) * 0.1
    params["lin_b"] = jax.random.normal(kb, (1, odim), jnp.float32) * 0.1
    params["pos_embed_alpha"] = jnp.float32(1.0)
    return params


def pitch_predictor_forward(xs, params, pos_table):
    """xs: [B, T, idim] -> [B, T, odim], single fused pallas_call."""
    B, T, idim = xs.shape
    n_layers = len(params["layers"])
    kernel_size = params["layers"][0][0].shape[0]
    n_chans = params["layers"][0][0].shape[2]
    odim = params["lin_w"].shape[1]

    # glue: positional-embedding lookup + alpha scale (gather stays in XLA)
    pos = params["pos_embed_alpha"] * positional_embeddings(xs, pos_table)

    flat_inputs = [xs, pos]
    in_specs = [
        pl.BlockSpec((1, T, idim), lambda b: (b, 0, 0)),
        pl.BlockSpec((1, T, idim), lambda b: (b, 0, 0)),
    ]

    # conv weights reshaped to (K*Cin, Cout) for the im2col matmul; constant
    # index_maps keep them resident in VMEM across grid steps.
    for (w, b, g, beta) in params["layers"]:
        K, Cin, Cout = w.shape
        flat_inputs += [w.reshape(K * Cin, Cout), b, g, beta]
        in_specs += [
            pl.BlockSpec((K * Cin, Cout), lambda i: (0, 0)),
            pl.BlockSpec((1, Cout), lambda i: (0, 0)),
            pl.BlockSpec((1, Cout), lambda i: (0, 0)),
            pl.BlockSpec((1, Cout), lambda i: (0, 0)),
        ]

    # final linear, zero-padded to OPAD output lanes (lane-dense store)
    lin_w_p = jnp.zeros((n_chans, OPAD), jnp.float32).at[:, :odim].set(
        params["lin_w"])
    lin_b_p = jnp.zeros((1, OPAD), jnp.float32).at[:, :odim].set(
        params["lin_b"])
    flat_inputs += [lin_w_p, lin_b_p]
    in_specs += [
        pl.BlockSpec((n_chans, OPAD), lambda i: (0, 0)),
        pl.BlockSpec((1, OPAD), lambda i: (0, 0)),
    ]

    out_padded = pl.pallas_call(
        make_fused_kernel(n_layers, kernel_size, T),
        out_shape=jax.ShapeDtypeStruct((B, T, OPAD), jnp.float32),
        grid=(B,),
        in_specs=in_specs,
        out_specs=pl.BlockSpec((1, T, OPAD), lambda b: (b, 0, 0)),
        compiler_params=pltpu.CompilerParams(
            dimension_semantics=("parallel",)),
    )(*flat_inputs)

    return out_padded[:, :, :odim]


# ----------------------------- pure-JAX reference ---------------------------

def reference_forward(xs, params, pos_table):
    kernel_size = params["layers"][0][0].shape[0]
    pad = kernel_size // 2
    pos = params["pos_embed_alpha"] * positional_embeddings(xs, pos_table)
    x = xs + pos
    for (w, b, g, beta) in params["layers"]:
        xp = jnp.pad(x, ((0, 0), (pad, pad), (0, 0)))
        y = lax.conv_general_dilated(
            xp, w, window_strides=(1,), padding="VALID",
            dimension_numbers=("NWC", "WIO", "NWC")) + b[None]
        y = jnp.maximum(y, 0.0)
        mean = jnp.mean(y, axis=-1, keepdims=True)
        var = jnp.mean((y - mean) ** 2, axis=-1, keepdims=True)
        x = (y - mean) * lax.rsqrt(var + 1e-12) * g[None] + beta[None]
    return jnp.dot(x, params["lin_w"]) + params["lin_b"][None]


# ----------------------------- main -----------------------------------------

if __name__ == "__main__":
    B, T = 2, 16
    idim, n_chans, odim = 16, 32, 2
    n_layers, kernel_size = 5, 5

    key = jax.random.PRNGKey(0)
    key, kx, kp = jax.random.split(key, 3)
    xs = jax.random.normal(kx, (B, T, idim), jnp.float32)

    params = init_params(kp, idim, n_layers, n_chans, odim, kernel_size)
    pos_table = sinusoidal_table(4096, idim, padding_idx=0)

    fwd = jax.jit(pitch_predictor_forward)
    out = fwd(xs, params, pos_table)
    out = jax.block_until_ready(out)

    ref = reference_forward(xs, params, pos_table)
    assert out.shape == (B, T, odim), out.shape
    assert jnp.allclose(out, ref, atol=2e-3, rtol=2e-3), (
        float(jnp.max(jnp.abs(out - ref))))

    print("KERNEL_OK")
</pallas_src>

<mosaic_0001>
module attributes {stable_mosaic.version = 11 : i64} {
  func.func @kernel(%arg0: i32, %arg1: memref<1x16x16xf32, #tpu.memory_space<vmem>>, %arg2: memref<1x16x16xf32, #tpu.memory_space<vmem>>, %arg3: memref<80x32xf32, #tpu.memory_space<vmem>>, %arg4: memref<1x32xf32, #tpu.memory_space<vmem>>, %arg5: memref<1x32xf32, #tpu.memory_space<vmem>>, %arg6: memref<1x32xf32, #tpu.memory_space<vmem>>, %arg7: memref<160x32xf32, #tpu.memory_space<vmem>>, %arg8: memref<1x32xf32, #tpu.memory_space<vmem>>, %arg9: memref<1x32xf32, #tpu.memory_space<vmem>>, %arg10: memref<1x32xf32, #tpu.memory_space<vmem>>, %arg11: memref<160x32xf32, #tpu.memory_space<vmem>>, %arg12: memref<1x32xf32, #tpu.memory_space<vmem>>, %arg13: memref<1x32xf32, #tpu.memory_space<vmem>>, %arg14: memref<1x32xf32, #tpu.memory_space<vmem>>, %arg15: memref<160x32xf32, #tpu.memory_space<vmem>>, %arg16: memref<1x32xf32, #tpu.memory_space<vmem>>, %arg17: memref<1x32xf32, #tpu.memory_space<vmem>>, %arg18: memref<1x32xf32, #tpu.memory_space<vmem>>, %arg19: memref<160x32xf32, #tpu.memory_space<vmem>>, %arg20: memref<1x32xf32, #tpu.memory_space<vmem>>, %arg21: memref<1x32xf32, #tpu.memory_space<vmem>>, %arg22: memref<1x32xf32, #tpu.memory_space<vmem>>, %arg23: memref<32x128xf32, #tpu.memory_space<vmem>>, %arg24: memref<1x128xf32, #tpu.memory_space<vmem>>, %arg25: memref<1x16x128xf32, #tpu.memory_space<vmem>>) attributes {dimension_semantics = [#tpu.dimension_semantics<parallel>], iteration_bounds = array<i64: 2>, scalar_prefetch = 0 : i64, scratch_operands = 0 : i64, tpu.core_type = #tpu.core_type<tc>, window_params = [{transform_indices = @transform_0, window_bounds = array<i64: 1, 16, 16>}, {transform_indices = @transform_1, window_bounds = array<i64: 1, 16, 16>}, {pipeline_mode = #tpu.pipeline_mode<synchronous>, transform_indices = @transform_2, window_bounds = array<i64: 80, 32>}, {pipeline_mode = #tpu.pipeline_mode<synchronous>, transform_indices = @transform_3, window_bounds = array<i64: 1, 32>}, {pipeline_mode = #tpu.pipeline_mode<synchronous>, transform_indices = @transform_4, window_bounds = array<i64: 1, 32>}, {pipeline_mode = #tpu.pipeline_mode<synchronous>, transform_indices = @transform_5, window_bounds = array<i64: 1, 32>}, {pipeline_mode = #tpu.pipeline_mode<synchronous>, transform_indices = @transform_6, window_bounds = array<i64: 160, 32>}, {pipeline_mode = #tpu.pipeline_mode<synchronous>, transform_indices = @transform_7, window_bounds = array<i64: 1, 32>}, {pipeline_mode = #tpu.pipeline_mode<synchronous>, transform_indices = @transform_8, window_bounds = array<i64: 1, 32>}, {pipeline_mode = #tpu.pipeline_mode<synchronous>, transform_indices = @transform_9, window_bounds = array<i64: 1, 32>}, {pipeline_mode = #tpu.pipeline_mode<synchronous>, transform_indices = @transform_10, window_bounds = array<i64: 160, 32>}, {pipeline_mode = #tpu.pipeline_mode<synchronous>, transform_indices = @transform_11, window_bounds = array<i64: 1, 32>}, {pipeline_mode = #tpu.pipeline_mode<synchronous>, transform_indices = @transform_12, window_bounds = array<i64: 1, 32>}, {pipeline_mode = #tpu.pipeline_mode<synchronous>, transform_indices = @transform_13, window_bounds = array<i64: 1, 32>}, {pipeline_mode = #tpu.pipeline_mode<synchronous>, transform_indices = @transform_14, window_bounds = array<i64: 160, 32>}, {pipeline_mode = #tpu.pipeline_mode<synchronous>, transform_indices = @transform_15, window_bounds = array<i64: 1, 32>}, {pipeline_mode = #tpu.pipeline_mode<synchronous>, transform_indices = @transform_16, window_bounds = array<i64: 1, 32>}, {pipeline_mode = #tpu.pipeline_mode<synchronous>, transform_indices = @transform_17, window_bounds = array<i64: 1, 32>}, {pipeline_mode = #tpu.pipeline_mode<synchronous>, transform_indices = @transform_18, window_bounds = array<i64: 160, 32>}, {pipeline_mode = #tpu.pipeline_mode<synchronous>, transform_indices = @transform_19, window_bounds = array<i64: 1, 32>}, {pipeline_mode = #tpu.pipeline_mode<synchronous>, transform_indices = @transform_20, window_bounds = array<i64: 1, 32>}, {pipeline_mode = #tpu.pipeline_mode<synchronous>, transform_indices = @transform_21, window_bounds = array<i64: 1, 32>}, {pipeline_mode = #tpu.pipeline_mode<synchronous>, transform_indices = @transform_22, window_bounds = array<i64: 32, 128>}, {pipeline_mode = #tpu.pipeline_mode<synchronous>, transform_indices = @transform_23, window_bounds = array<i64: 1, 128>}, {transform_indices = @transform_24, window_bounds = array<i64: 1, 16, 128>}]} {
    %c0 = arith.constant 0 : index
    %c0_0 = arith.constant 0 : index
    %c0_1 = arith.constant 0 : index
    %0 = vector.load %arg1[%c0, %c0_0, %c0_1] : memref<1x16x16xf32, #tpu.memory_space<vmem>>, vector<1x16x16xf32>
    %1 = vector.shape_cast %0 : vector<1x16x16xf32> to vector<16x16xf32>
    %c0_2 = arith.constant 0 : index
    %c0_3 = arith.constant 0 : index
    %c0_4 = arith.constant 0 : index
    %2 = vector.load %arg2[%c0_2, %c0_3, %c0_4] : memref<1x16x16xf32, #tpu.memory_space<vmem>>, vector<1x16x16xf32>
    %3 = vector.shape_cast %2 : vector<1x16x16xf32> to vector<16x16xf32>
    %4 = arith.addf %1, %3 : vector<16x16xf32>
    %cst = arith.constant 0.000000e+00 : f32
    %5 = vector.broadcast %cst : f32 to vector<2x16xf32>
    %6 = tpu.concatenate %5, %4, %5 in 0 : vector<2x16xf32>, vector<16x16xf32>, vector<2x16xf32> -> vector<20x16xf32>
    %7 = vector.extract_strided_slice %6 {offsets = [0, 0], sizes = [16, 16], strides = [1, 1]} : vector<20x16xf32> to vector<16x16xf32>
    %8 = vector.extract_strided_slice %6 {offsets = [1, 0], sizes = [16, 16], strides = [1, 1]} : vector<20x16xf32> to vector<16x16xf32>
    %9 = vector.extract_strided_slice %6 {offsets = [2, 0], sizes = [16, 16], strides = [1, 1]} : vector<20x16xf32> to vector<16x16xf32>
    %10 = vector.extract_strided_slice %6 {offsets = [3, 0], sizes = [16, 16], strides = [1, 1]} : vector<20x16xf32> to vector<16x16xf32>
    %11 = vector.extract_strided_slice %6 {offsets = [4, 0], sizes = [16, 16], strides = [1, 1]} : vector<20x16xf32> to vector<16x16xf32>
    %12 = tpu.concatenate %7, %8, %9, %10, %11 in 1 : vector<16x16xf32>, vector<16x16xf32>, vector<16x16xf32>, vector<16x16xf32>, vector<16x16xf32> -> vector<16x80xf32>
    %c0_5 = arith.constant 0 : index
    %c0_6 = arith.constant 0 : index
    %13 = vector.load %arg3[%c0_5, %c0_6] : memref<80x32xf32, #tpu.memory_space<vmem>>, vector<80x32xf32>
    %cst_7 = arith.constant dense<0.000000e+00> : vector<16x32xf32>
    %14 = tpu.matmul %12, %13, %cst_7 {dimension_numbers = #tpu.dot_dimension_numbers<[1], [0], [0], [1], [0, 0, 1, 1], [], []>} : vector<16x80xf32>, vector<80x32xf32>, vector<16x32xf32> -> vector<16x32xf32>
    %c0_8 = arith.constant 0 : index
    %c0_9 = arith.constant 0 : index
    %15 = vector.load %arg4[%c0_8, %c0_9] : memref<1x32xf32, #tpu.memory_space<vmem>>, vector<1x32xf32>
    %16 = vector.broadcast %15 : vector<1x32xf32> to vector<16x32xf32>
    %17 = arith.addf %14, %16 : vector<16x32xf32>
    %cst_10 = arith.constant 0.000000e+00 : f32
    %18 = vector.broadcast %cst_10 : f32 to vector<16x32xf32>
    %19 = arith.maximumf %17, %18 : vector<16x32xf32>
    %cst_11 = arith.constant dense<0.000000e+00> : vector<16xf32>
    %20 = vector.multi_reduction <add>, %19, %cst_11 [1] : vector<16x32xf32> to vector<16xf32>
    %21 = vector.shape_cast %20 : vector<16xf32> to vector<16x1xf32>
    %22 = arith.mulf %19, %19 : vector<16x32xf32>
    %cst_12 = arith.constant dense<0.000000e+00> : vector<16xf32>
    %23 = vector.multi_reduction <add>, %22, %cst_12 [1] : vector<16x32xf32> to vector<16xf32>
    %24 = vector.shape_cast %23 : vector<16xf32> to vector<16x1xf32>
    %cst_13 = arith.constant 3.125000e-02 : f32
    %25 = vector.broadcast %cst_13 : f32 to vector<16x1xf32>
    %26 = arith.mulf %21, %25 : vector<16x1xf32>
    %cst_14 = arith.constant 3.125000e-02 : f32
    %27 = vector.broadcast %cst_14 : f32 to vector<16x1xf32>
    %28 = arith.mulf %24, %27 : vector<16x1xf32>
    %29 = arith.mulf %26, %26 : vector<16x1xf32>
    %30 = arith.subf %28, %29 : vector<16x1xf32>
    %cst_15 = arith.constant 0.000000e+00 : f32
    %31 = vector.broadcast %cst_15 : f32 to vector<16x1xf32>
    %32 = arith.maximumf %30, %31 : vector<16x1xf32>
    %33 = vector.broadcast %26 : vector<16x1xf32> to vector<16x32xf32>
    %34 = arith.subf %19, %33 : vector<16x32xf32>
    %cst_16 = arith.constant 9.99999996E-13 : f32
    %35 = vector.broadcast %cst_16 : f32 to vector<16x1xf32>
    %36 = arith.addf %32, %35 : vector<16x1xf32>
    %37 = math.rsqrt %36 : vector<16x1xf32>
    %38 = vector.broadcast %37 : vector<16x1xf32> to vector<16x32xf32>
    %39 = arith.mulf %34, %38 : vector<16x32xf32>
    %c0_17 = arith.constant 0 : index
    %c0_18 = arith.constant 0 : index
    %40 = vector.load %arg5[%c0_17, %c0_18] : memref<1x32xf32, #tpu.memory_space<vmem>>, vector<1x32xf32>
    %41 = vector.broadcast %40 : vector<1x32xf32> to vector<16x32xf32>
    %42 = arith.mulf %39, %41 : vector<16x32xf32>
    %c0_19 = arith.constant 0 : index
    %c0_20 = arith.constant 0 : index
    %43 = vector.load %arg6[%c0_19, %c0_20] : memref<1x32xf32, #tpu.memory_space<vmem>>, vector<1x32xf32>
    %44 = vector.broadcast %43 : vector<1x32xf32> to vector<16x32xf32>
    %45 = arith.addf %42, %44 : vector<16x32xf32>
    %cst_21 = arith.constant 0.000000e+00 : f32
    %46 = vector.broadcast %cst_21 : f32 to vector<2x32xf32>
    %47 = tpu.concatenate %46, %45, %46 in 0 : vector<2x32xf32>, vector<16x32xf32>, vector<2x32xf32> -> vector<20x32xf32>
    %48 = vector.extract_strided_slice %47 {offsets = [0, 0], sizes = [16, 32], strides = [1, 1]} : vector<20x32xf32> to vector<16x32xf32>
    %49 = vector.extract_strided_slice %47 {offsets = [1, 0], sizes = [16, 32], strides = [1, 1]} : vector<20x32xf32> to vector<16x32xf32>
    %50 = vector.extract_strided_slice %47 {offsets = [2, 0], sizes = [16, 32], strides = [1, 1]} : vector<20x32xf32> to vector<16x32xf32>
    %51 = vector.extract_strided_slice %47 {offsets = [3, 0], sizes = [16, 32], strides = [1, 1]} : vector<20x32xf32> to vector<16x32xf32>
    %52 = vector.extract_strided_slice %47 {offsets = [4, 0], sizes = [16, 32], strides = [1, 1]} : vector<20x32xf32> to vector<16x32xf32>
    %53 = tpu.concatenate %48, %49, %50, %51, %52 in 1 : vector<16x32xf32>, vector<16x32xf32>, vector<16x32xf32>, vector<16x32xf32>, vector<16x32xf32> -> vector<16x160xf32>
    %c0_22 = arith.constant 0 : index
    %c0_23 = arith.constant 0 : index
    %54 = vector.load %arg7[%c0_22, %c0_23] : memref<160x32xf32, #tpu.memory_space<vmem>>, vector<160x32xf32>
    %cst_24 = arith.constant dense<0.000000e+00> : vector<16x32xf32>
    %55 = tpu.matmul %53, %54, %cst_24 {dimension_numbers = #tpu.dot_dimension_numbers<[1], [0], [0], [1], [0, 0, 1, 1], [], []>} : vector<16x160xf32>, vector<160x32xf32>, vector<16x32xf32> -> vector<16x32xf32>
    %c0_25 = arith.constant 0 : index
    %c0_26 = arith.constant 0 : index
    %56 = vector.load %arg8[%c0_25, %c0_26] : memref<1x32xf32, #tpu.memory_space<vmem>>, vector<1x32xf32>
    %57 = vector.broadcast %56 : vector<1x32xf32> to vector<16x32xf32>
    %58 = arith.addf %55, %57 : vector<16x32xf32>
    %cst_27 = arith.constant 0.000000e+00 : f32
    %59 = vector.broadcast %cst_27 : f32 to vector<16x32xf32>
    %60 = arith.maximumf %58, %59 : vector<16x32xf32>
    %cst_28 = arith.constant dense<0.000000e+00> : vector<16xf32>
    %61 = vector.multi_reduction <add>, %60, %cst_28 [1] : vector<16x32xf32> to vector<16xf32>
    %62 = vector.shape_cast %61 : vector<16xf32> to vector<16x1xf32>
    %63 = arith.mulf %60, %60 : vector<16x32xf32>
    %cst_29 = arith.constant dense<0.000000e+00> : vector<16xf32>
    %64 = vector.multi_reduction <add>, %63, %cst_29 [1] : vector<16x32xf32> to vector<16xf32>
    %65 = vector.shape_cast %64 : vector<16xf32> to vector<16x1xf32>
    %cst_30 = arith.constant 3.125000e-02 : f32
    %66 = vector.broadcast %cst_30 : f32 to vector<16x1xf32>
    %67 = arith.mulf %62, %66 : vector<16x1xf32>
    %cst_31 = arith.constant 3.125000e-02 : f32
    %68 = vector.broadcast %cst_31 : f32 to vector<16x1xf32>
    %69 = arith.mulf %65, %68 : vector<16x1xf32>
    %70 = arith.mulf %67, %67 : vector<16x1xf32>
    %71 = arith.subf %69, %70 : vector<16x1xf32>
    %cst_32 = arith.constant 0.000000e+00 : f32
    %72 = vector.broadcast %cst_32 : f32 to vector<16x1xf32>
    %73 = arith.maximumf %71, %72 : vector<16x1xf32>
    %74 = vector.broadcast %67 : vector<16x1xf32> to vector<16x32xf32>
    %75 = arith.subf %60, %74 : vector<16x32xf32>
    %cst_33 = arith.constant 9.99999996E-13 : f32
    %76 = vector.broadcast %cst_33 : f32 to vector<16x1xf32>
    %77 = arith.addf %73, %76 : vector<16x1xf32>
    %78 = math.rsqrt %77 : vector<16x1xf32>
    %79 = vector.broadcast %78 : vector<16x1xf32> to vector<16x32xf32>
    %80 = arith.mulf %75, %79 : vector<16x32xf32>
    %c0_34 = arith.constant 0 : index
    %c0_35 = arith.constant 0 : index
    %81 = vector.load %arg9[%c0_34, %c0_35] : memref<1x32xf32, #tpu.memory_space<vmem>>, vector<1x32xf32>
    %82 = vector.broadcast %81 : vector<1x32xf32> to vector<16x32xf32>
    %83 = arith.mulf %80, %82 : vector<16x32xf32>
    %c0_36 = arith.constant 0 : index
    %c0_37 = arith.constant 0 : index
    %84 = vector.load %arg10[%c0_36, %c0_37] : memref<1x32xf32, #tpu.memory_space<vmem>>, vector<1x32xf32>
    %85 = vector.broadcast %84 : vector<1x32xf32> to vector<16x32xf32>
    %86 = arith.addf %83, %85 : vector<16x32xf32>
    %cst_38 = arith.constant 0.000000e+00 : f32
    %87 = vector.broadcast %cst_38 : f32 to vector<2x32xf32>
    %88 = tpu.concatenate %87, %86, %87 in 0 : vector<2x32xf32>, vector<16x32xf32>, vector<2x32xf32> -> vector<20x32xf32>
    %89 = vector.extract_strided_slice %88 {offsets = [0, 0], sizes = [16, 32], strides = [1, 1]} : vector<20x32xf32> to vector<16x32xf32>
    %90 = vector.extract_strided_slice %88 {offsets = [1, 0], sizes = [16, 32], strides = [1, 1]} : vector<20x32xf32> to vector<16x32xf32>
    %91 = vector.extract_strided_slice %88 {offsets = [2, 0], sizes = [16, 32], strides = [1, 1]} : vector<20x32xf32> to vector<16x32xf32>
    %92 = vector.extract_strided_slice %88 {offsets = [3, 0], sizes = [16, 32], strides = [1, 1]} : vector<20x32xf32> to vector<16x32xf32>
    %93 = vector.extract_strided_slice %88 {offsets = [4, 0], sizes = [16, 32], strides = [1, 1]} : vector<20x32xf32> to vector<16x32xf32>
    %94 = tpu.concatenate %89, %90, %91, %92, %93 in 1 : vector<16x32xf32>, vector<16x32xf32>, vector<16x32xf32>, vector<16x32xf32>, vector<16x32xf32> -> vector<16x160xf32>
    %c0_39 = arith.constant 0 : index
    %c0_40 = arith.constant 0 : index
    %95 = vector.load %arg11[%c0_39, %c0_40] : memref<160x32xf32, #tpu.memory_space<vmem>>, vector<160x32xf32>
    %cst_41 = arith.constant dense<0.000000e+00> : vector<16x32xf32>
    %96 = tpu.matmul %94, %95, %cst_41 {dimension_numbers = #tpu.dot_dimension_numbers<[1], [0], [0], [1], [0, 0, 1, 1], [], []>} : vector<16x160xf32>, vector<160x32xf32>, vector<16x32xf32> -> vector<16x32xf32>
    %c0_42 = arith.constant 0 : index
    %c0_43 = arith.constant 0 : index
    %97 = vector.load %arg12[%c0_42, %c0_43] : memref<1x32xf32, #tpu.memory_space<vmem>>, vector<1x32xf32>
    %98 = vector.broadcast %97 : vector<1x32xf32> to vector<16x32xf32>
    %99 = arith.addf %96, %98 : vector<16x32xf32>
    %cst_44 = arith.constant 0.000000e+00 : f32
    %100 = vector.broadcast %cst_44 : f32 to vector<16x32xf32>
    %101 = arith.maximumf %99, %100 : vector<16x32xf32>
    %cst_45 = arith.constant dense<0.000000e+00> : vector<16xf32>
    %102 = vector.multi_reduction <add>, %101, %cst_45 [1] : vector<16x32xf32> to vector<16xf32>
    %103 = vector.shape_cast %102 : vector<16xf32> to vector<16x1xf32>
    %104 = arith.mulf %101, %101 : vector<16x32xf32>
    %cst_46 = arith.constant dense<0.000000e+00> : vector<16xf32>
    %105 = vector.multi_reduction <add>, %104, %cst_46 [1] : vector<16x32xf32> to vector<16xf32>
    %106 = vector.shape_cast %105 : vector<16xf32> to vector<16x1xf32>
    %cst_47 = arith.constant 3.125000e-02 : f32
    %107 = vector.broadcast %cst_47 : f32 to vector<16x1xf32>
    %108 = arith.mulf %103, %107 : vector<16x1xf32>
    %cst_48 = arith.constant 3.125000e-02 : f32
    %109 = vector.broadcast %cst_48 : f32 to vector<16x1xf32>
    %110 = arith.mulf %106, %109 : vector<16x1xf32>
    %111 = arith.mulf %108, %108 : vector<16x1xf32>
    %112 = arith.subf %110, %111 : vector<16x1xf32>
    %cst_49 = arith.constant 0.000000e+00 : f32
    %113 = vector.broadcast %cst_49 : f32 to vector<16x1xf32>
    %114 = arith.maximumf %112, %113 : vector<16x1xf32>
    %115 = vector.broadcast %108 : vector<16x1xf32> to vector<16x32xf32>
    %116 = arith.subf %101, %115 : vector<16x32xf32>
    %cst_50 = arith.constant 9.99999996E-13 : f32
    %117 = vector.broadcast %cst_50 : f32 to vector<16x1xf32>
    %118 = arith.addf %114, %117 : vector<16x1xf32>
    %119 = math.rsqrt %118 : vector<16x1xf32>
    %120 = vector.broadcast %119 : vector<16x1xf32> to vector<16x32xf32>
    %121 = arith.mulf %116, %120 : vector<16x32xf32>
    %c0_51 = arith.constant 0 : index
    %c0_52 = arith.constant 0 : index
    %122 = vector.load %arg13[%c0_51, %c0_52] : memref<1x32xf32, #tpu.memory_space<vmem>>, vector<1x32xf32>
    %123 = vector.broadcast %122 : vector<1x32xf32> to vector<16x32xf32>
    %124 = arith.mulf %121, %123 : vector<16x32xf32>
    %c0_53 = arith.constant 0 : index
    %c0_54 = arith.constant 0 : index
    %125 = vector.load %arg14[%c0_53, %c0_54] : memref<1x32xf32, #tpu.memory_space<vmem>>, vector<1x32xf32>
    %126 = vector.broadcast %125 : vector<1x32xf32> to vector<16x32xf32>
    %127 = arith.addf %124, %126 : vector<16x32xf32>
    %cst_55 = arith.constant 0.000000e+00 : f32
    %128 = vector.broadcast %cst_55 : f32 to vector<2x32xf32>
    %129 = tpu.concatenate %128, %127, %128 in 0 : vector<2x32xf32>, vector<16x32xf32>, vector<2x32xf32> -> vector<20x32xf32>
    %130 = vector.extract_strided_slice %129 {offsets = [0, 0], sizes = [16, 32], strides = [1, 1]} : vector<20x32xf32> to vector<16x32xf32>
    %131 = vector.extract_strided_slice %129 {offsets = [1, 0], sizes = [16, 32], strides = [1, 1]} : vector<20x32xf32> to vector<16x32xf32>
    %132 = vector.extract_strided_slice %129 {offsets = [2, 0], sizes = [16, 32], strides = [1, 1]} : vector<20x32xf32> to vector<16x32xf32>
    %133 = vector.extract_strided_slice %129 {offsets = [3, 0], sizes = [16, 32], strides = [1, 1]} : vector<20x32xf32> to vector<16x32xf32>
    %134 = vector.extract_strided_slice %129 {offsets = [4, 0], sizes = [16, 32], strides = [1, 1]} : vector<20x32xf32> to vector<16x32xf32>
    %135 = tpu.concatenate %130, %131, %132, %133, %134 in 1 : vector<16x32xf32>, vector<16x32xf32>, vector<16x32xf32>, vector<16x32xf32>, vector<16x32xf32> -> vector<16x160xf32>
    %c0_56 = arith.constant 0 : index
    %c0_57 = arith.constant 0 : index
    %136 = vector.load %arg15[%c0_56, %c0_57] : memref<160x32xf32, #tpu.memory_space<vmem>>, vector<160x32xf32>
    %cst_58 = arith.constant dense<0.000000e+00> : vector<16x32xf32>
    %137 = tpu.matmul %135, %136, %cst_58 {dimension_numbers = #tpu.dot_dimension_numbers<[1], [0], [0], [1], [0, 0, 1, 1], [], []>} : vector<16x160xf32>, vector<160x32xf32>, vector<16x32xf32> -> vector<16x32xf32>
    %c0_59 = arith.constant 0 : index
    %c0_60 = arith.constant 0 : index
    %138 = vector.load %arg16[%c0_59, %c0_60] : memref<1x32xf32, #tpu.memory_space<vmem>>, vector<1x32xf32>
    %139 = vector.broadcast %138 : vector<1x32xf32> to vector<16x32xf32>
    %140 = arith.addf %137, %139 : vector<16x32xf32>
    %cst_61 = arith.constant 0.000000e+00 : f32
    %141 = vector.broadcast %cst_61 : f32 to vector<16x32xf32>
    %142 = arith.maximumf %140, %141 : vector<16x32xf32>
    %cst_62 = arith.constant dense<0.000000e+00> : vector<16xf32>
    %143 = vector.multi_reduction <add>, %142, %cst_62 [1] : vector<16x32xf32> to vector<16xf32>
    %144 = vector.shape_cast %143 : vector<16xf32> to vector<16x1xf32>
    %145 = arith.mulf %142, %142 : vector<16x32xf32>
    %cst_63 = arith.constant dense<0.000000e+00> : vector<16xf32>
    %146 = vector.multi_reduction <add>, %145, %cst_63 [1] : vector<16x32xf32> to vector<16xf32>
    %147 = vector.shape_cast %146 : vector<16xf32> to vector<16x1xf32>
    %cst_64 = arith.constant 3.125000e-02 : f32
    %148 = vector.broadcast %cst_64 : f32 to vector<16x1xf32>
    %149 = arith.mulf %144, %148 : vector<16x1xf32>
    %cst_65 = arith.constant 3.125000e-02 : f32
    %150 = vector.broadcast %cst_65 : f32 to vector<16x1xf32>
    %151 = arith.mulf %147, %150 : vector<16x1xf32>
    %152 = arith.mulf %149, %149 : vector<16x1xf32>
    %153 = arith.subf %151, %152 : vector<16x1xf32>
    %cst_66 = arith.constant 0.000000e+00 : f32
    %154 = vector.broadcast %cst_66 : f32 to vector<16x1xf32>
    %155 = arith.maximumf %153, %154 : vector<16x1xf32>
    %156 = vector.broadcast %149 : vector<16x1xf32> to vector<16x32xf32>
    %157 = arith.subf %142, %156 : vector<16x32xf32>
    %cst_67 = arith.constant 9.99999996E-13 : f32
    %158 = vector.broadcast %cst_67 : f32 to vector<16x1xf32>
    %159 = arith.addf %155, %158 : vector<16x1xf32>
    %160 = math.rsqrt %159 : vector<16x1xf32>
    %161 = vector.broadcast %160 : vector<16x1xf32> to vector<16x32xf32>
    %162 = arith.mulf %157, %161 : vector<16x32xf32>
    %c0_68 = arith.constant 0 : index
    %c0_69 = arith.constant 0 : index
    %163 = vector.load %arg17[%c0_68, %c0_69] : memref<1x32xf32, #tpu.memory_space<vmem>>, vector<1x32xf32>
    %164 = vector.broadcast %163 : vector<1x32xf32> to vector<16x32xf32>
    %165 = arith.mulf %162, %164 : vector<16x32xf32>
    %c0_70 = arith.constant 0 : index
    %c0_71 = arith.constant 0 : index
    %166 = vector.load %arg18[%c0_70, %c0_71] : memref<1x32xf32, #tpu.memory_space<vmem>>, vector<1x32xf32>
    %167 = vector.broadcast %166 : vector<1x32xf32> to vector<16x32xf32>
    %168 = arith.addf %165, %167 : vector<16x32xf32>
    %cst_72 = arith.constant 0.000000e+00 : f32
    %169 = vector.broadcast %cst_72 : f32 to vector<2x32xf32>
    %170 = tpu.concatenate %169, %168, %169 in 0 : vector<2x32xf32>, vector<16x32xf32>, vector<2x32xf32> -> vector<20x32xf32>
    %171 = vector.extract_strided_slice %170 {offsets = [0, 0], sizes = [16, 32], strides = [1, 1]} : vector<20x32xf32> to vector<16x32xf32>
    %172 = vector.extract_strided_slice %170 {offsets = [1, 0], sizes = [16, 32], strides = [1, 1]} : vector<20x32xf32> to vector<16x32xf32>
    %173 = vector.extract_strided_slice %170 {offsets = [2, 0], sizes = [16, 32], strides = [1, 1]} : vector<20x32xf32> to vector<16x32xf32>
    %174 = vector.extract_strided_slice %170 {offsets = [3, 0], sizes = [16, 32], strides = [1, 1]} : vector<20x32xf32> to vector<16x32xf32>
    %175 = vector.extract_strided_slice %170 {offsets = [4, 0], sizes = [16, 32], strides = [1, 1]} : vector<20x32xf32> to vector<16x32xf32>
    %176 = tpu.concatenate %171, %172, %173, %174, %175 in 1 : vector<16x32xf32>, vector<16x32xf32>, vector<16x32xf32>, vector<16x32xf32>, vector<16x32xf32> -> vector<16x160xf32>
    %c0_73 = arith.constant 0 : index
    %c0_74 = arith.constant 0 : index
    %177 = vector.load %arg19[%c0_73, %c0_74] : memref<160x32xf32, #tpu.memory_space<vmem>>, vector<160x32xf32>
    %cst_75 = arith.constant dense<0.000000e+00> : vector<16x32xf32>
    %178 = tpu.matmul %176, %177, %cst_75 {dimension_numbers = #tpu.dot_dimension_numbers<[1], [0], [0], [1], [0, 0, 1, 1], [], []>} : vector<16x160xf32>, vector<160x32xf32>, vector<16x32xf32> -> vector<16x32xf32>
    %c0_76 = arith.constant 0 : index
    %c0_77 = arith.constant 0 : index
    %179 = vector.load %arg20[%c0_76, %c0_77] : memref<1x32xf32, #tpu.memory_space<vmem>>, vector<1x32xf32>
    %180 = vector.broadcast %179 : vector<1x32xf32> to vector<16x32xf32>
    %181 = arith.addf %178, %180 : vector<16x32xf32>
    %cst_78 = arith.constant 0.000000e+00 : f32
    %182 = vector.broadcast %cst_78 : f32 to vector<16x32xf32>
    %183 = arith.maximumf %181, %182 : vector<16x32xf32>
    %cst_79 = arith.constant dense<0.000000e+00> : vector<16xf32>
    %184 = vector.multi_reduction <add>, %183, %cst_79 [1] : vector<16x32xf32> to vector<16xf32>
    %185 = vector.shape_cast %184 : vector<16xf32> to vector<16x1xf32>
    %186 = arith.mulf %183, %183 : vector<16x32xf32>
    %cst_80 = arith.constant dense<0.000000e+00> : vector<16xf32>
    %187 = vector.multi_reduction <add>, %186, %cst_80 [1] : vector<16x32xf32> to vector<16xf32>
    %188 = vector.shape_cast %187 : vector<16xf32> to vector<16x1xf32>
    %cst_81 = arith.constant 3.125000e-02 : f32
    %189 = vector.broadcast %cst_81 : f32 to vector<16x1xf32>
    %190 = arith.mulf %185, %189 : vector<16x1xf32>
    %cst_82 = arith.constant 3.125000e-02 : f32
    %191 = vector.broadcast %cst_82 : f32 to vector<16x1xf32>
    %192 = arith.mulf %188, %191 : vector<16x1xf32>
    %193 = arith.mulf %190, %190 : vector<16x1xf32>
    %194 = arith.subf %192, %193 : vector<16x1xf32>
    %cst_83 = arith.constant 0.000000e+00 : f32
    %195 = vector.broadcast %cst_83 : f32 to vector<16x1xf32>
    %196 = arith.maximumf %194, %195 : vector<16x1xf32>
    %197 = vector.broadcast %190 : vector<16x1xf32> to vector<16x32xf32>
    %198 = arith.subf %183, %197 : vector<16x32xf32>
    %cst_84 = arith.constant 9.99999996E-13 : f32
    %199 = vector.broadcast %cst_84 : f32 to vector<16x1xf32>
    %200 = arith.addf %196, %199 : vector<16x1xf32>
    %201 = math.rsqrt %200 : vector<16x1xf32>
    %202 = vector.broadcast %201 : vector<16x1xf32> to vector<16x32xf32>
    %203 = arith.mulf %198, %202 : vector<16x32xf32>
    %c0_85 = arith.constant 0 : index
    %c0_86 = arith.constant 0 : index
    %204 = vector.load %arg21[%c0_85, %c0_86] : memref<1x32xf32, #tpu.memory_space<vmem>>, vector<1x32xf32>
    %205 = vector.broadcast %204 : vector<1x32xf32> to vector<16x32xf32>
    %206 = arith.mulf %203, %205 : vector<16x32xf32>
    %c0_87 = arith.constant 0 : index
    %c0_88 = arith.constant 0 : index
    %207 = vector.load %arg22[%c0_87, %c0_88] : memref<1x32xf32, #tpu.memory_space<vmem>>, vector<1x32xf32>
    %208 = vector.broadcast %207 : vector<1x32xf32> to vector<16x32xf32>
    %209 = arith.addf %206, %208 : vector<16x32xf32>
    %c0_89 = arith.constant 0 : index
    %c0_90 = arith.constant 0 : index
    %210 = vector.load %arg23[%c0_89, %c0_90] : memref<32x128xf32, #tpu.memory_space<vmem>>, vector<32x128xf32>
    %cst_91 = arith.constant dense<0.000000e+00> : vector<16x128xf32>
    %211 = tpu.matmul %209, %210, %cst_91 {dimension_numbers = #tpu.dot_dimension_numbers<[1], [0], [0], [1], [0, 0, 1, 1], [], []>} : vector<16x32xf32>, vector<32x128xf32>, vector<16x128xf32> -> vector<16x128xf32>
    %c0_92 = arith.constant 0 : index
    %c0_93 = arith.constant 0 : index
    %212 = vector.load %arg24[%c0_92, %c0_93] : memref<1x128xf32, #tpu.memory_space<vmem>>, vector<1x128xf32>
    %213 = vector.broadcast %212 : vector<1x128xf32> to vector<16x128xf32>
    %214 = arith.addf %211, %213 : vector<16x128xf32>
    %c0_94 = arith.constant 0 : index
    %c0_95 = arith.constant 0 : index
    %c0_96 = arith.constant 0 : index
    %215 = vector.load %arg25[%c0_94, %c0_95, %c0_96] : memref<1x16x128xf32, #tpu.memory_space<vmem>>, vector<1x16x128xf32>
    %216 = vector.shape_cast %215 : vector<1x16x128xf32> to vector<16x128xf32>
    %217 = vector.shape_cast %214 : vector<16x128xf32> to vector<1x16x128xf32>
    tpu.vector_store %arg25[%c0_94, %c0_95, %c0_96], %217 {strides = array<i32>} : memref<1x16x128xf32, #tpu.memory_space<vmem>>, vector<1x16x128xf32>,
    return
  }
  func.func @transform_0(%arg0: i32) -> (i32, i32, i32) {
    %c0_i32 = arith.constant 0 : i32
    %c0_i32_0 = arith.constant 0 : i32
    %c0_i32_1 = arith.constant 0 : i32
    return %arg0, %c0_i32, %c0_i32_0 : i32, i32, i32
  }
  func.func @transform_1(%arg0: i32) -> (i32, i32, i32) {
    %c0_i32 = arith.constant 0 : i32
    %c0_i32_0 = arith.constant 0 : i32
    %c0_i32_1 = arith.constant 0 : i32
    return %arg0, %c0_i32, %c0_i32_0 : i32, i32, i32
  }
  func.func @transform_2(%arg0: i32) -> (i32, i32) {
    %c0_i32 = arith.constant 0 : i32
    %c0_i32_0 = arith.constant 0 : i32
    %c0_i32_1 = arith.constant 0 : i32
    return %c0_i32, %c0_i32_0 : i32, i32
  }
  func.func @transform_3(%arg0: i32) -> (i32, i32) {
    %c0_i32 = arith.constant 0 : i32
    %c0_i32_0 = arith.constant 0 : i32
    %c0_i32_1 = arith.constant 0 : i32
    return %c0_i32, %c0_i32_0 : i32, i32
  }
  func.func @transform_4(%arg0: i32) -> (i32, i32) {
    %c0_i32 = arith.constant 0 : i32
    %c0_i32_0 = arith.constant 0 : i32
    %c0_i32_1 = arith.constant 0 : i32
    return %c0_i32, %c0_i32_0 : i32, i32
  }
  func.func @transform_5(%arg0: i32) -> (i32, i32) {
    %c0_i32 = arith.constant 0 : i32
    %c0_i32_0 = arith.constant 0 : i32
    %c0_i32_1 = arith.constant 0 : i32
    return %c0_i32, %c0_i32_0 : i32, i32
  }
  func.func @transform_6(%arg0: i32) -> (i32, i32) {
    %c0_i32 = arith.constant 0 : i32
    %c0_i32_0 = arith.constant 0 : i32
    %c0_i32_1 = arith.constant 0 : i32
    return %c0_i32, %c0_i32_0 : i32, i32
  }
  func.func @transform_7(%arg0: i32) -> (i32, i32) {
    %c0_i32 = arith.constant 0 : i32
    %c0_i32_0 = arith.constant 0 : i32
    %c0_i32_1 = arith.constant 0 : i32
    return %c0_i32, %c0_i32_0 : i32, i32
  }
  func.func @transform_8(%arg0: i32) -> (i32, i32) {
    %c0_i32 = arith.constant 0 : i32
    %c0_i32_0 = arith.constant 0 : i32
    %c0_i32_1 = arith.constant 0 : i32
    return %c0_i32, %c0_i32_0 : i32, i32
  }
  func.func @transform_9(%arg0: i32) -> (i32, i32) {
    %c0_i32 = arith.constant 0 : i32
    %c0_i32_0 = arith.constant 0 : i32
    %c0_i32_1 = arith.constant 0 : i32
    return %c0_i32, %c0_i32_0 : i32, i32
  }
  func.func @transform_10(%arg0: i32) -> (i32, i32) {
    %c0_i32 = arith.constant 0 : i32
    %c0_i32_0 = arith.constant 0 : i32
    %c0_i32_1 = arith.constant 0 : i32
    return %c0_i32, %c0_i32_0 : i32, i32
  }
  func.func @transform_11(%arg0: i32) -> (i32, i32) {
    %c0_i32 = arith.constant 0 : i32
    %c0_i32_0 = arith.constant 0 : i32
    %c0_i32_1 = arith.constant 0 : i32
    return %c0_i32, %c0_i32_0 : i32, i32
  }
  func.func @transform_12(%arg0: i32) -> (i32, i32) {
    %c0_i32 = arith.constant 0 : i32
    %c0_i32_0 = arith.constant 0 : i32
    %c0_i32_1 = arith.constant 0 : i32
    return %c0_i32, %c0_i32_0 : i32, i32
  }
  func.func @transform_13(%arg0: i32) -> (i32, i32) {
    %c0_i32 = arith.constant 0 : i32
    %c0_i32_0 = arith.constant 0 : i32
    %c0_i32_1 = arith.constant 0 : i32
    return %c0_i32, %c0_i32_0 : i32, i32
  }
  func.func @transform_14(%arg0: i32) -> (i32, i32) {
    %c0_i32 = arith.constant 0 : i32
    %c0_i32_0 = arith.constant 0 : i32
    %c0_i32_1 = arith.constant 0 : i32
    return %c0_i32, %c0_i32_0 : i32, i32
  }
  func.func @transform_15(%arg0: i32) -> (i32, i32) {
    %c0_i32 = arith.constant 0 : i32
    %c0_i32_0 = arith.constant 0 : i32
    %c0_i32_1 = arith.constant 0 : i32
    return %c0_i32, %c0_i32_0 : i32, i32
  }
  func.func @transform_16(%arg0: i32) -> (i32, i32) {
    %c0_i32 = arith.constant 0 : i32
    %c0_i32_0 = arith.constant 0 : i32
    %c0_i32_1 = arith.constant 0 : i32
    return %c0_i32, %c0_i32_0 : i32, i32
  }
  func.func @transform_17(%arg0: i32) -> (i32, i32) {
    %c0_i32 = arith.constant 0 : i32
    %c0_i32_0 = arith.constant 0 : i32
    %c0_i32_1 = arith.constant 0 : i32
    return %c0_i32, %c0_i32_0 : i32, i32
  }
  func.func @transform_18(%arg0: i32) -> (i32, i32) {
    %c0_i32 = arith.constant 0 : i32
    %c0_i32_0 = arith.constant 0 : i32
    %c0_i32_1 = arith.constant 0 : i32
    return %c0_i32, %c0_i32_0 : i32, i32
  }
  func.func @transform_19(%arg0: i32) -> (i32, i32) {
    %c0_i32 = arith.constant 0 : i32
    %c0_i32_0 = arith.constant 0 : i32
    %c0_i32_1 = arith.constant 0 : i32
    return %c0_i32, %c0_i32_0 : i32, i32
  }
  func.func @transform_20(%arg0: i32) -> (i32, i32) {
    %c0_i32 = arith.constant 0 : i32
    %c0_i32_0 = arith.constant 0 : i32
    %c0_i32_1 = arith.constant 0 : i32
    return %c0_i32, %c0_i32_0 : i32, i32
  }
  func.func @transform_21(%arg0: i32) -> (i32, i32) {
    %c0_i32 = arith.constant 0 : i32
    %c0_i32_0 = arith.constant 0 : i32
    %c0_i32_1 = arith.constant 0 : i32
    return %c0_i32, %c0_i32_0 : i32, i32
  }
  func.func @transform_22(%arg0: i32) -> (i32, i32) {
    %c0_i32 = arith.constant 0 : i32
    %c0_i32_0 = arith.constant 0 : i32
    %c0_i32_1 = arith.constant 0 : i32
    return %c0_i32, %c0_i32_0 : i32, i32
  }
  func.func @transform_23(%arg0: i32) -> (i32, i32) {
    %c0_i32 = arith.constant 0 : i32
    %c0_i32_0 = arith.constant 0 : i32
    %c0_i32_1 = arith.constant 0 : i32
    return %c0_i32, %c0_i32_0 : i32, i32
  }
  func.func @transform_24(%arg0: i32) -> (i32, i32, i32) {
    %c0_i32 = arith.constant 0 : i32
    %c0_i32_0 = arith.constant 0 : i32
    %c0_i32_1 = arith.constant 0 : i32
    return %arg0, %c0_i32, %c0_i32_0 : i32, i32, i32
  }
}

</mosaic_0001>

<bundles_post_ra>
// kernel: pitch_predictor_forward.1
= control target key start
LH: loop header
LB: loop body
LE: loop exit
PB: predicated region body
PF: predicated region fallthrough
CT: control target
= control target key end

     0   :  { %s2619_s0 = inlined_call_operand.vmem [shape: f32[2,16,16], index: 0, kind: input, shape index: {}]   ;;  %s2620_s1 = inlined_call_operand.vmem [shape: f32[2,16,16], index: 1, kind: input, shape index: {}]   ;;  %s2621_s2 = inlined_call_operand.vmem [shape: f32[80,32], index: 2, kind: input, shape index: {}]   ;;  %s2622_s3 = inlined_call_operand.vmem [shape: f32[1,32], index: 3, kind: input, shape index: {}]   ;;  %s2623_s4 = inlined_call_operand.vmem [shape: f32[1,32], index: 4, kind: input, shape index: {}]   ;;  %s2624_s5 = inlined_call_operand.vmem [shape: f32[1,32], index: 5, kind: input, shape index: {}]   ;;  %s2625_s6 = inlined_call_operand.vmem [shape: f32[160,32], index: 6, kind: input, shape index: {}]   ;;  %s2626_s7 = inlined_call_operand.vmem [shape: f32[1,32], index: 7, kind: input, shape index: {}]   ;;  %s2627_s8 = inlined_call_operand.vmem [shape: f32[1,32], index: 8, kind: input, shape index: {}]   ;;  %s2628_s9 = inlined_call_operand.vmem [shape: f32[1,32], index: 9, kind: input, shape index: {}]   ;;  %s2629_s10 = inlined_call_operand.vmem [shape: f32[160,32], index: 10, kind: input, shape index: {}]   ;;  %s2630_s11 = inlined_call_operand.vmem [shape: f32[1,32], index: 11, kind: input, shape index: {}]   ;;  %s2631_s12 = inlined_call_operand.vmem [shape: f32[1,32], index: 12, kind: input, shape index: {}]   ;;  %s2632_s13 = inlined_call_operand.vmem [shape: f32[1,32], index: 13, kind: input, shape index: {}]   ;;  %s2633_s14 = inlined_call_operand.vmem [shape: f32[160,32], index: 14, kind: input, shape index: {}]   ;;  %s2634_s15 = inlined_call_operand.vmem [shape: f32[1,32], index: 15, kind: input, shape index: {}]   ;;  %s2635_s16 = inlined_call_operand.vmem [shape: f32[1,32], index: 16, kind: input, shape index: {}]   ;;  %s2636_s17 = inlined_call_operand.vmem [shape: f32[1,32], index: 17, kind: input, shape index: {}]   ;;  %s2637_s18 = inlined_call_operand.vmem [shape: f32[160,32], index: 18, kind: input, shape index: {}]   ;;  %s2638_s19 = inlined_call_operand.vmem [shape: f32[1,32], index: 19, kind: input, shape index: {}]   ;;  %s2639_s20 = inlined_call_operand.vmem [shape: f32[1,32], index: 20, kind: input, shape index: {}]   ;;  %s2640_s21 = inlined_call_operand.vmem [shape: f32[1,32], index: 21, kind: input, shape index: {}]   ;;  %s2641_s22 = inlined_call_operand.vmem [shape: f32[32,128], index: 22, kind: input, shape index: {}]   ;;  %s2642_s23 = inlined_call_operand.vmem [shape: f32[1,128], index: 23, kind: input, shape index: {}]   ;;  %s2643_s24 = inlined_call_operand.vmem [shape: f32[2,16,128], index: 24, kind: output, shape index: {}]  }
   0x1   :  { %2653 = sst [smem:[#allocation3_spill]] %s2619_s0 }
   0x2   :  { %2654 = sst [smem:[#allocation4_spill]] %s2620_s1 }
   0x3   :  { %2655 = sst [smem:[#allocation5_spill]] %s2621_s2 }
   0x4   :  { %2656 = sst [smem:[#allocation6_spill]] %s2622_s3 }
   0x5   :  { %2657 = sst [smem:[#allocation7_spill]] %s2623_s4 }
   0x6   :  { %2658 = sst [smem:[#allocation8_spill]] %s2624_s5  ;;  %s2043_s5 = smov 0  }
   0x7   :  { %2659 = sst [smem:[#allocation9_spill]] %s2625_s6 }
   0x8   :  { %2660 = sst [smem:[#allocation10_spill]] %s2626_s7 }
   0x9   :  { %2661 = sst [smem:[#allocation11_spill]] %s2627_s8 }
   0xa LB: > { %2662 = sst [smem:[#allocation2_spill]] %s1911_s5  ;;  %s1828_s26 = sadd.s32 4294967295, %s1911_s5   ;;  %s1911_s5 = sphi %s2043_s5, %s34_s5  }
   0xb   : > { %p1832_p0 = scmp.ge.s32.totalorder %s1911_s5, 1  ;;  %p672_p1 = scmp.lt.s32.totalorder %s1911_s5, 3 }
   0xd   : > { %p673_p2 = pnand %p1832_p0, %p672_p1 }
   0xe   : > { %p743_p3 = scmp.lt.s32.totalorder (!%p673_p2), %s1828_s26, 1  ;;  %s2663_s6 = sld [smem:[#allocation5_spill]] (!%p673_p2) }
   0xf   : > { %676 = sbr.rel (%p673_p2) target bundleno = 2258 (0x8d2), region = 116  ;;  %s2664_s1 = sld [smem:[#allocation3_spill]] (!%p673_p2) }
  0x10   : > { %s2665_s29 = sld [smem:[#allocation4_spill]] (!%p673_p2)  ;;  %s2647_s0 = smov (!%p673_p2), 32  }
  0x11   : > { %s2649_s7 = smov (!%p673_p2), 64   ;;  %s2666_s4 = sld [smem:[#allocation6_spill]] (!%p673_p2) }
  0x12   : > { %s2667_s28 = sld [smem:[#allocation9_spill]] (!%p673_p2) }
  0x14   : > { %v846_v0 = vld [vmem:[%s2663_s6 + $0x48] sm:$0xff]  ;;  %v845_v1 = vld [vmem:[%s2663_s6 + $0x40] sm:$0xff]  ;;  %s2677_s26 = smov (!%p743_p3, %s1828_s26), 1  ;;  %v844_v2 = vld [vmem:[%s2663_s6 + $0x38] sm:$0xff]  ;;  %vm766_vm0 = vcmask 1041408   ;;  %vm777_vm1 = vcmask 1046528  }
  0x15   : > { %864 = vmatpush.msra.mxu0 %v846_v0  ;;  %s2060_s30 = sshll.u32 %s2677_s26, 4  ;;  %v843_v3 = vld [vmem:[%s2663_s6 + $0x30] sm:$0xff]  ;;  %vm801_vm2 = vcmask 1044480   ;;  %s1914_s26 = smov 48   ;;  %vm789_vm3 = vcmask 1045504   ;;  %vm813_vm4 = vcmask 1043456  }
  0x16   : > { %s747_s27 = scalar_lea.vmem %s2664_s1, %s2060_s30  ;;  %s752_s5 = scalar_lea.vmem %s2665_s29, %s2060_s30  ;;  %v842_v35 = vld [vmem:[%s2663_s6 + $0x28] sm:$0xff]  ;;  %v841_v36 = vld [vmem:[%s2663_s6 + $0x20] sm:$0xff]  ;;  %v840_v37 = vld [vmem:[%s2663_s6 + $0x18] sm:$0xff]  ;;  %vm825_vm5 = vcmask 130048   ;;  %vm828_vm6 = vcmask 261120   ;;  %vm831_vm7 = vcmask 392192  }
  0x17   : > { %865 = vmatpush.msra.mxu0 %v845_v1  ;;  %v758_v4 = vld [vmem:[%s747_s27] sm:$0xff]  ;;  %v759_v5 = vld [vmem:[%s747_s27 + $0x8] sm:$0xff]  ;;  %v839_v38 = vld [vmem:[%s2663_s6 + $0x10] sm:$0xff]  ;;  %vm834_vm8 = vcmask 523264   ;;  %vm851_vm9 = vcmask 654336   ;;  %s2668_s1 = sld [smem:[#allocation7_spill]] }
  0x18   : > { %v760_v6 = vld [vmem:[%s752_s5] sm:$0xff]  ;;  %v761_v7 = vld [vmem:[%s752_s5 + $0x8] sm:$0xff]  ;;  %s1913_s5 = smov 16   ;;  %s2674_s27 = smov 96  }
  0x19   : > { %866 = vmatpush.msra.mxu0 %v844_v2  ;;  %v762_v8 = vadd.f32 %v760_v6, %v758_v4  ;;  %v763_v9 = vadd.f32 %v761_v7, %v759_v5  ;;  %v838_v39 = vld [vmem:[%s2663_s6 + $0x8] sm:$0xff]  ;;  %v837_v40 = vld [vmem:[%s2663_s6] sm:$0xff] }
  0x1a   : > { %v1869_v57 = vld [vmem:[%s2666_s4] ss:$0 sm:$0xff]  ;;  %s2669_s4 = sld [smem:[#allocation8_spill]] }
  0x1b   : > { %867 = vmatpush.msra.mxu0 %v843_v3  ;;  %v767_v10 = vrot.slane %v762_v8, 6  ;;  %v768_v11 = vrot.slane %v763_v9, 6 }
  0x1d   : > { %v773_v12 = vsel %vm766_vm0, 0.0, %v767_v10  ;;  %v2075_v13 = vsel %vm766_vm0, %v767_v10, %v768_v11  ;;  %v774_v20 = vsel %vm766_vm0, %v768_v11, 0.0  ;;  %868 = vmatpush.msra.mxu0 %v842_v35 }
  0x1e   : > { %v778_v14 = vrot.slane %v773_v12, 1  ;;  %v802_v15 = vrot.slane %v773_v12, 3  ;;  %v779_v16 = vrot.slane %v2075_v13, 1  ;;  %v803_v17 = vrot.slane %v2075_v13, 3 }
  0x1f   : > { %v781_v21 = vrot.slane %v774_v20, 1  ;;  %v790_v22 = vrot.slane %v773_v12, 2  ;;  %v791_v23 = vrot.slane %v2075_v13, 2  ;;  %v814_v24 = vrot.slane %v773_v12, 4  ;;  %869 = vmatpush.msra.mxu0 %v841_v36  ;;  %v1017_v36 = vld [vmem:[%s2667_s28 + $0x78] sm:$0xff] }
  0x20   : > { %v780_v18 = vsel %vm777_vm1, %v778_v14, %v779_v16  ;;  %v804_v19 = vsel %vm801_vm2, %v802_v15, %v803_v17  ;;  %v815_v25 = vrot.slane %v2075_v13, 4  ;;  %v793_v27 = vrot.slane %v774_v20, 2  ;;  %1030 = vmatpush.msra.mxu1 %v1017_v36 }
  0x21   : > { %783 = vrot.lane.b32.xlu0 %v780_v18, %s1913_s5  ;;  %807 = vrot.lane.b32.xlu1 %v804_v19, %s1914_s26  ;;  %v782_v26 = vsel %vm777_vm1, %v779_v16, %v781_v21  ;;  %v792_v28 = vsel %vm789_vm3, %v790_v22, %v791_v23  ;;  %v805_v31 = vrot.slane %v774_v20, 3  ;;  %v817_v32 = vrot.slane %v774_v20, 4  ;;  %v1020_v20 = vld [vmem:[%s2667_s28 + $0x90] sm:$0xff]  ;;  %v1019_v21 = vld [vmem:[%s2667_s28 + $0x88] sm:$0xff] }
  0x22   : > { %785 = vrot.lane.b32.xlu2 %v782_v26, %s1913_s5  ;;  %v816_v29 = vsel %vm813_vm4, %v814_v24, %v815_v25  ;;  %v794_v30 = vsel %vm789_vm3, %v791_v23, %v793_v27  ;;  %870 = vmatpush.msra.mxu0 %v840_v37  ;;  %v1018_v23 = vld [vmem:[%s2667_s28 + $0x80] sm:$0xff]  ;;  %v1016_v37 = vld [vmem:[%s2667_s28 + $0x70] sm:$0xff]  ;;  %s2673_s5 = smov 64  }
  0x23   : > { %v806_v33 = vsel %vm801_vm2, %v803_v17, %v805_v31  ;;  %v818_v34 = vsel %vm813_vm4, %v815_v25, %v817_v32  ;;  %v1021_v17 = vld [vmem:[%s2667_s28 + $0x98] sm:$0xff]  ;;  %v1870_v32 = vld [vmem:[%s2668_s1] ss:$0 sm:$0xff]  ;;  %1031 = vmatpush.msra.mxu1 %v1016_v37  ;;  %s2651_s1 = smov 96  }
  0x24   : > { %871 = vmatpush.msra.mxu0 %v839_v38  ;;  %1065 = vmatpush.msra.mxu2 %v1021_v17  ;;  %v1011_v17 = vld [vmem:[%s2667_s28 + $0x48] sm:$0xff] }
  0x26   : > { %872 = vmatpush.msra.mxu0 %v838_v39  ;;  %1066 = vmatpush.msra.mxu2 %v1020_v20  ;;  %v1008_v20 = vld [vmem:[%s2667_s28 + $0x30] sm:$0xff] }
  0x28   : > { %873 = vmatpush.msra.mxu0 %v837_v40  ;;  %1067 = vmatpush.msra.mxu2 %v1019_v21  ;;  %v1007_v21 = vld [vmem:[%s2667_s28 + $0x28] sm:$0xff] }
  0x29   : > { %795 = vrot.lane.b32.xlu0 %v792_v28, %s2647_s0  ;;  %819 = vrot.lane.b32.xlu1 %v816_v29, %s2649_s7 }
  0x2a   : > { %797 = vrot.lane.b32.xlu2 %v794_v30, %s2647_s0  ;;  %1068 = vmatpush.msra.mxu2 %v1018_v23  ;;  %v1005_v23 = vld [vmem:[%s2667_s28 + $0x18] sm:$0xff] }
  0x31   : > { %809 = vrot.lane.b32.xlu0 %v806_v33, %s1914_s26  ;;  %821 = vrot.lane.b32.xlu1 %v818_v34, %s2649_s7 }
  0x7c   : > { %v786_v43 = vpop.permute.xlu2 %785 }
  0x7d   : > { %v827_v50 = vsel %vm825_vm5, %v2075_v13, %v786_v43 }
  0x84   : > { %v798_v51 = vpop.permute.xlu2 %797 }
  0x85   : > { %v830_v52 = vsel %vm828_vm6, %v827_v50, %v798_v51 }
  0x93   : > { %v784_v41 = vpop.permute.xlu0 %783  ;;  %v808_v42 = vpop.permute.xlu1 %807 }
  0x94   : > { %v826_v44 = vsel %vm825_vm5, %v773_v12, %v784_v41  ;;  %v1015_v41 = vld [vmem:[%s2667_s28 + $0x68] sm:$0xff]  ;;  %vm999_vm5 = vcmask 785408  }
  0x95   : > { %1032 = vmatpush.msra.mxu1 %v1015_v41 }
  0x9b   : > { %v796_v45 = vpop.permute.xlu0 %795  ;;  %v820_v46 = vpop.permute.xlu1 %819 }
  0x9c   : > { %v829_v47 = vsel %vm828_vm6, %v826_v44, %v796_v45 }
  0x9d   : > { %v832_v48 = vsel %vm831_vm7, %v829_v47, %v808_v42  ;;  %v1871_v42 = vld [vmem:[%s2669_s4] ss:$0 sm:$0xff]  ;;  %s2671_s4 = sld [smem:[#allocation11_spill]] }
  0x9e   : > { %v835_v49 = vsel %vm834_vm8, %v832_v48, %v820_v46 }
  0x9f   : > { %1839 = vmatmul.msk.f32.vlgmr.msra.gmra.mxu0 %vm851_vm9, %v835_v49 }
  0xa3   : > { %v810_v53 = vpop.permute.xlu0 %809  ;;  %v822_v54 = vpop.permute.xlu1 %821 }
  0xa4   : > { %v833_v55 = vsel %vm831_vm7, %v830_v52, %v810_v53 }
  0xa5   : > { %v836_v56 = vsel %vm834_vm8, %v833_v55, %v822_v54 }
  0xa7   : > { %1840 = vmatmul.msk.f32.gmra.mxu0 %vm851_vm9, %v836_v56 }
 0x11c   : > { %v875_v58 = vpop.f32.mrf.mxu0 }
 0x11d   : > { %v876_v59 = vadd.f32 %v1869_v57, %v875_v58 }
 0x11f   : > { %v881_v60 = vmax.f32 %v876_v59, 0.0 }
 0x121   : > { %v883_v61 = vsel %vm828_vm6, %v881_v60, 0.0  ;;  %v889_v62 = vmul.f32 %v881_v60, %v881_v60 }
 0x122   : > { %884 = vadd.xlane.f32.xlu2 %v883_v61 }
 0x123   : > { %v891_v63 = vsel %vm828_vm6, %v889_v62, 0.0 }
 0x124   : > { %892 = vadd.xlane.f32.xlu1 %v891_v63  ;;  %v878_v0 = vpop.f32.mrf.mxu0 }
 0x125   : > { %v879_v1 = vadd.f32 %v1869_v57, %v878_v0 }
 0x127   : > { %v2122_v2 = vmax.f32 %v879_v1, 0.0 }
 0x129   : > { %v886_v3 = vsel %vm828_vm6, %v2122_v2, 0.0  ;;  %v890_v4 = vmul.f32 %v2122_v2, %v2122_v2 }
 0x12a   : > { %887 = vadd.xlane.f32.xlu0 %v886_v3 }
 0x12b   : > { %v894_v5 = vsel %vm828_vm6, %v890_v4, 0.0 }
 0x12c   : > { %895 = vadd.xlane.f32.xlu2 %v894_v5 }
 0x195   : > { %v885_v6 = vpop.xlane.xlu2 %884 }
 0x196   : > { %v897_v7 = vmul.f32 0.03125, %v885_v6 }
 0x197   : > { %v893_v8 = vpop.xlane.xlu1 %892 }
 0x198   : > { %v901_v9 = vmul.f32 %v897_v7, %v897_v7  ;;  %v899_v10 = vmul.f32 0.03125, %v893_v8  ;;  %v907_v34 = vsub.f32 %v881_v60, %v897_v7 }
 0x19a   : > { %v903_v11 = vsub.f32 %v899_v10, %v901_v9 }
 0x19c   : > { %v905_v12 = vmax.f32 %v903_v11, 0.0 }
 0x19d   : > { %v888_v13 = vpop.xlane.xlu0 %887 }
 0x19e   : > { %v909_v14 = vadd.f32 1e-12, %v905_v12  ;;  %v898_v15 = vmul.f32 0.03125, %v888_v13 }
 0x19f   : > { %v896_v16 = vpop.xlane.xlu2 %895 }
 0x1a0   : > { %1885 = vrsqrt.f32 %v909_v14  ;;  %v902_v18 = vmul.f32 %v898_v15, %v898_v15  ;;  %v900_v19 = vmul.f32 0.03125, %v896_v16  ;;  %vm917_vm11 = vweird.f32 %v909_v14  ;;  %v1012_v16 = vld [vmem:[%s2667_s28 + $0x50] sm:$0xff] }
 0x1a1   : > { %v908_v48 = vsub.f32 %v2122_v2, %v898_v15  ;;  %v1013_v15 = vld [vmem:[%s2667_s28 + $0x58] sm:$0xff] }
 0x1a2   : > { %v904_v22 = vsub.f32 %v900_v19, %v902_v18  ;;  %v1010_v18 = vld [vmem:[%s2667_s28 + $0x40] sm:$0xff]  ;;  %v1009_v19 = vld [vmem:[%s2667_s28 + $0x38] sm:$0xff] }
 0x1a4   : > { %v906_v24 = vmax.f32 %v904_v22, 0.0  ;;  %v1006_v22 = vld [vmem:[%s2667_s28 + $0x20] sm:$0xff] }
 0x1a6   : > { %v1886_v25 = vpop.eup %1885  ;;  %v910_v27 = vadd.f32 1e-12, %v906_v24  ;;  %v1004_v24 = vld [vmem:[%s2667_s28 + $0x10] sm:$0xff] }
 0x1a7   : > { %v912_v26 = vmul.f32 %v1886_v25, %v909_v14  ;;  %vm918_vm10 = vweird.f32 %v1886_v25  ;;  %v1014_v14 = vld [vmem:[%s2667_s28 + $0x60] sm:$0xff] }
 0x1a8   : > { %1887 = vrsqrt.f32 %v910_v27  ;;  %vm919_vm12 = vmor %vm917_vm11, %vm918_vm10  ;;  %vm927_vm14 = vweird.f32 %v910_v27  ;;  %1033 = vmatpush.msra.mxu1 %v1014_v14 }
 0x1a9   : > { %v913_v28 = vmul.f32 %v1886_v25, %v912_v26  ;;  %v1002_v26 = vld [vmem:[%s2667_s28] sm:$0xff] }
 0x1aa   : > { %1034 = vmatpush.msra.mxu1 %v1013_v15 }
 0x1ab   : > { %v914_v29 = vmul.f32 0.5, %v913_v28 }
 0x1ac   : > { %1035 = vmatpush.msra.mxu1 %v1012_v16 }
 0x1ad   : > { %v915_v30 = vsub.f32 1.5, %v914_v29 }
 0x1ae   : > { %v1888_v31 = vpop.eup %1887  ;;  %1036 = vmatpush.msra.mxu1 %v1011_v17 }
 0x1af   : > { %v916_v33 = vmul.f32 %v1886_v25, %v915_v30  ;;  %v922_v35 = vmul.f32 %v1888_v31, %v910_v27  ;;  %vm928_vm13 = vweird.f32 %v1888_v31 }
 0x1b0   : > { %vm929_vm15 = vmor %vm927_vm14, %vm928_vm13  ;;  %1037 = vmatpush.msra.mxu1 %v1010_v18  ;;  %v1873_v18 = vld [vmem:[%s2671_s4] ss:$0 sm:$0xff]  ;;  %s757_s4 = scalar_lea.vmem %s2643_s24, %s2060_s30 }
 0x1b1   : > { %v920_v38 = vsel %vm919_vm12, %v1886_v25, %v916_v33  ;;  %v923_v40 = vmul.f32 %v1888_v31, %v922_v35  ;;  %v1003_v25 = vld [vmem:[%s2667_s28 + $0x8] sm:$0xff] }
 0x1b2   : > { %v931_v39 = vmul.f32 %v920_v38, %v907_v34  ;;  %1038 = vmatpush.msra.mxu1 %v1009_v19 }
 0x1b3   : > { %v924_v44 = vmul.f32 0.5, %v923_v40 }
 0x1b4   : > { %v937_v43 = vmul.f32 %v1870_v32, %v931_v39  ;;  %1039 = vmatpush.msra.mxu1 %v1008_v20 }
 0x1b5   : > { %v925_v45 = vsub.f32 1.5, %v924_v44 }
 0x1b6   : > { %v943_v46 = vadd.f32 %v1871_v42, %v937_v43  ;;  %1040 = vmatpush.msra.mxu1 %v1007_v21 }
 0x1b7   : > { %v926_v47 = vmul.f32 %v1888_v31, %v925_v45 }
 0x1b8   : > { %v947_v51 = vrot.slane %v943_v46, 6  ;;  %1041 = vmatpush.msra.mxu1 %v1006_v22  ;;  %v1211_v22 = vld [vmem:[%s2629_s10 + $0x78] sm:$0xff] }
 0x1b9   : > { %v930_v49 = vsel %vm929_vm15, %v1888_v31, %v926_v47  ;;  %1224 = vmatpush.msra.mxu3 %v1211_v22 }
 0x1ba   : > { %v932_v50 = vmul.f32 %v930_v49, %v908_v48  ;;  %v2158_v54 = vsel %vm766_vm0, 0.0, %v947_v51  ;;  %1042 = vmatpush.msra.mxu1 %v1005_v23  ;;  %v1210_v23 = vld [vmem:[%s2629_s10 + $0x70] sm:$0xff] }
 0x1bb   : > { %v990_v56 = vrot.slane %v2158_v54, 4  ;;  %v979_v58 = vrot.slane %v2158_v54, 3  ;;  %v968_v59 = vrot.slane %v2158_v54, 2  ;;  %v957_v60 = vrot.slane %v2158_v54, 1  ;;  %1225 = vmatpush.msra.mxu3 %v1210_v23 }
 0x1bc   : > { %v938_v52 = vmul.f32 %v1870_v32, %v932_v50  ;;  %1043 = vmatpush.msra.mxu1 %v1004_v24 }
 0x1be   : > { %v944_v53 = vadd.f32 %v1871_v42, %v938_v52  ;;  %1044 = vmatpush.msra.mxu1 %v1003_v25 }
 0x1c0   : > { %v948_v55 = vrot.slane %v944_v53, 6  ;;  %1045 = vmatpush.msra.mxu1 %v1002_v26 }
 0x1c2   : > { %v2162_v57 = vsel %vm766_vm0, %v947_v51, %v948_v55  ;;  %v954_v5 = vsel %vm766_vm0, %v948_v55, 0.0 }
 0x1c3   : > { %v991_v61 = vrot.slane %v2162_v57, 4  ;;  %v980_v62 = vrot.slane %v2162_v57, 3  ;;  %v969_v63 = vrot.slane %v2162_v57, 2  ;;  %v958_v0 = vrot.slane %v2162_v57, 1 }
 0x1c4   : > { %v993_v6 = vrot.slane %v954_v5, 4  ;;  %v982_v7 = vrot.slane %v954_v5, 3  ;;  %v960_v8 = vrot.slane %v954_v5, 1  ;;  %v971_v9 = vrot.slane %v954_v5, 2 }
 0x1c5   : > { %v992_v1 = vsel %vm813_vm4, %v990_v56, %v991_v61  ;;  %v981_v2 = vsel %vm801_vm2, %v979_v58, %v980_v62  ;;  %v970_v3 = vsel %vm789_vm3, %v968_v59, %v969_v63  ;;  %v959_v4 = vsel %vm777_vm1, %v957_v60, %v958_v0 }
 0x1c6   : > { %1841 = vmatmul.msk.f32.vlgmr.msra.gmra.mxu2 %vm828_vm6, %v992_v1  ;;  %984 = vrot.lane.b32.xlu1 %v981_v2, %s2651_s1  ;;  %v994_v10 = vsel %vm813_vm4, %v991_v61, %v993_v6  ;;  %v983_v11 = vsel %vm801_vm2, %v980_v62, %v982_v7  ;;  %v961_v12 = vsel %vm777_vm1, %v958_v0, %v960_v8  ;;  %v1214_v6 = vld [vmem:[%s2629_s10 + $0x90] sm:$0xff]  ;;  %v1213_v7 = vld [vmem:[%s2629_s10 + $0x88] sm:$0xff] }
 0x1c7   : > { %973 = vrot.lane.b32.xlu0 %v970_v3, %s2649_s7  ;;  %962 = vrot.lane.b32.xlu2 %v959_v4, %s2647_s0  ;;  %v972_v13 = vsel %vm789_vm3, %v969_v63, %v971_v9  ;;  %v1215_v3 = vld [vmem:[%s2629_s10 + $0x98] sm:$0xff]  ;;  %v1212_v9 = vld [vmem:[%s2629_s10 + $0x80] sm:$0xff] }
 0x1c8   : > { %1259 = vmatpush.msrb.mxu2 %v1215_v3  ;;  %v1205_v3 = vld [vmem:[%s2629_s10 + $0x48] sm:$0xff] }
 0x1ca   : > { %1260 = vmatpush.msrb.mxu2 %v1214_v6  ;;  %v1202_v6 = vld [vmem:[%s2629_s10 + $0x30] sm:$0xff] }
 0x1cc   : > { %1261 = vmatpush.msrb.mxu2 %v1213_v7  ;;  %v1201_v7 = vld [vmem:[%s2629_s10 + $0x28] sm:$0xff] }
 0x1ce   : > { %1842 = vmatmul.msk.f32.gmra.mxu2 %vm828_vm6, %v994_v10  ;;  %986 = vrot.lane.b32.xlu1 %v983_v11, %s2651_s1 }
 0x1cf   : > { %964 = vrot.lane.b32.xlu0 %v961_v12, %s2647_s0  ;;  %975 = vrot.lane.b32.xlu2 %v972_v13, %s2649_s7  ;;  %s2670_s0 = sld [smem:[#allocation10_spill]] }
 0x1d0   : > { %1262 = vmatpush.msrb.mxu2 %v1212_v9  ;;  %v1199_v9 = vld [vmem:[%s2629_s10 + $0x18] sm:$0xff] }
 0x1d5   : > { %v1872_v39 = vld [vmem:[%s2670_s0] ss:$0 sm:$0xff]  ;;  %s2672_s0 = smov 32  }
 0x221   : > { %v963_v27 = vpop.permute.xlu2 %962 }
 0x222   : > { %v995_v29 = vsel %vm828_vm6, %v2158_v54, %v963_v27  ;;  %v1209_v27 = vld [vmem:[%s2629_s10 + $0x68] sm:$0xff] }
 0x223   : > { %1226 = vmatpush.msra.mxu3 %v1209_v27 }
 0x229   : > { %v976_v34 = vpop.permute.xlu2 %975 }
 0x238   : > { %v985_v28 = vpop.permute.xlu1 %984 }
 0x239   : > { %v974_v30 = vpop.permute.xlu0 %973 }
 0x23a   : > { %v997_v31 = vsel %vm834_vm8, %v995_v29, %v974_v30 }
 0x23b   : > { %v1000_v32 = vsel %vm999_vm5, %v997_v31, %v985_v28  ;;  %v1874_v28 = vld [vmem:[%s2628_s9] ss:$0 sm:$0xff] }
 0x23c   : > { %1046 = vmatmul.f32.vlgmr.msra.gmra.mxu1 %v1000_v32 }
 0x240   : > { %v987_v36 = vpop.permute.xlu1 %986 }
 0x241   : > { %v965_v33 = vpop.permute.xlu0 %964 }
 0x242   : > { %v996_v35 = vsel %vm828_vm6, %v2162_v57, %v965_v33 }
 0x243   : > { %v998_v37 = vsel %vm834_vm8, %v996_v35, %v976_v34 }
 0x244   : > { %v1001_v38 = vsel %vm999_vm5, %v998_v37, %v987_v36 }
 0x245   : > { %1049 = vmatmul.f32.gmra.mxu1 %v1001_v38 }
 0x249   : > { %v1070_v41 = vpop.f32.mrf.mxu2 }
 0x251   : > { %v1073_v50 = vpop.f32.mrf.mxu2 }
 0x2b9   : > { %v1047_v40 = vpop.f32.mrf.mxu1 }
 0x2ba   : > { %v1048_v42 = vadd.f32 %v1872_v39, %v1047_v40 }
 0x2bc   : > { %v1071_v43 = vadd.f32 %v1070_v41, %v1048_v42 }
 0x2be   : > { %v1076_v44 = vmax.f32 %v1071_v43, 0.0 }
 0x2c0   : > { %v1078_v45 = vsel %vm828_vm6, %v1076_v44, 0.0  ;;  %v1084_v46 = vmul.f32 %v1076_v44, %v1076_v44 }
 0x2c1   : > { %1079 = vadd.xlane.f32.xlu0 %v1078_v45 }
 0x2c2   : > { %v1050_v47 = vpop.f32.mrf.mxu1  ;;  %v1086_v48 = vsel %vm828_vm6, %v1084_v46, 0.0 }
 0x2c3   : > { %v1051_v49 = vadd.f32 %v1872_v39, %v1050_v47  ;;  %1087 = vadd.xlane.f32.xlu1 %v1086_v48 }
 0x2c5   : > { %v1074_v51 = vadd.f32 %v1073_v50, %v1051_v49 }
 0x2c7   : > { %v2240_v52 = vmax.f32 %v1074_v51, 0.0 }
 0x2c9   : > { %v1081_v53 = vsel %vm828_vm6, %v2240_v52, 0.0  ;;  %v1085_v54 = vmul.f32 %v2240_v52, %v2240_v52 }
 0x2ca   : > { %1082 = vadd.xlane.f32.xlu2 %v1081_v53 }
 0x2cb   : > { %v1089_v55 = vsel %vm828_vm6, %v1085_v54, 0.0 }
 0x2cc   : > { %1090 = vadd.xlane.f32.xlu0 %v1089_v55 }
 0x334   : > { %v1080_v56 = vpop.xlane.xlu0 %1079 }
 0x335   : > { %v1092_v57 = vmul.f32 0.03125, %v1080_v56 }
 0x336   : > { %v1088_v58 = vpop.xlane.xlu1 %1087 }
 0x337   : > { %v1096_v59 = vmul.f32 %v1092_v57, %v1092_v57  ;;  %v1094_v60 = vmul.f32 0.03125, %v1088_v58  ;;  %v1102_v20 = vsub.f32 %v1076_v44, %v1092_v57 }
 0x339   : > { %v1098_v61 = vsub.f32 %v1094_v60, %v1096_v59 }
 0x33b   : > { %v1100_v62 = vmax.f32 %v1098_v61, 0.0 }
 0x33d   : > { %v1104_v63 = vadd.f32 1e-12, %v1100_v62  ;;  %v1083_v0 = vpop.xlane.xlu2 %1082 }
 0x33e   : > { %v1093_v1 = vmul.f32 0.03125, %v1083_v0  ;;  %v1208_v0 = vld [vmem:[%s2629_s10 + $0x60] sm:$0xff] }
 0x33f   : > { %1889 = vrsqrt.f32 %v1104_v63  ;;  %v1091_v2 = vpop.xlane.xlu0 %1090  ;;  %vm1112_vm9 = vweird.f32 %v1104_v63  ;;  %1227 = vmatpush.msra.mxu3 %v1208_v0 }
 0x340   : > { %v1097_v4 = vmul.f32 %v1093_v1, %v1093_v1  ;;  %v1095_v5 = vmul.f32 0.03125, %v1091_v2  ;;  %v1103_v34 = vsub.f32 %v2240_v52, %v1093_v1  ;;  %v1207_v1 = vld [vmem:[%s2629_s10 + $0x58] sm:$0xff]  ;;  %v1206_v2 = vld [vmem:[%s2629_s10 + $0x50] sm:$0xff] }
 0x341   : > { %1228 = vmatpush.msra.mxu3 %v1207_v1 }
 0x342   : > { %v1099_v8 = vsub.f32 %v1095_v5, %v1097_v4  ;;  %v1204_v4 = vld [vmem:[%s2629_s10 + $0x40] sm:$0xff]  ;;  %v1203_v5 = vld [vmem:[%s2629_s10 + $0x38] sm:$0xff] }
 0x343   : > { %1229 = vmatpush.msra.mxu3 %v1206_v2 }
 0x344   : > { %v1101_v10 = vmax.f32 %v1099_v8, 0.0  ;;  %v1200_v8 = vld [vmem:[%s2629_s10 + $0x20] sm:$0xff] }
 0x345   : > { %v1890_v11 = vpop.eup %1889  ;;  %1230 = vmatpush.msra.mxu3 %v1205_v3 }
 0x346   : > { %v1107_v12 = vmul.f32 %v1890_v11, %v1104_v63  ;;  %v1105_v13 = vadd.f32 1e-12, %v1101_v10  ;;  %vm1113_vm7 = vweird.f32 %v1890_v11  ;;  %v1198_v10 = vld [vmem:[%s2629_s10 + $0x10] sm:$0xff] }
 0x347   : > { %vm1114_vm10 = vmor %vm1112_vm9, %vm1113_vm7  ;;  %1231 = vmatpush.msra.mxu3 %v1204_v4 }
 0x348   : > { %v1108_v14 = vmul.f32 %v1890_v11, %v1107_v12  ;;  %1891 = vrsqrt.f32 %v1105_v13  ;;  %vm1122_vm12 = vweird.f32 %v1105_v13  ;;  %v1196_v12 = vld [vmem:[%s2629_s10] sm:$0xff] }
 0x349   : > { %1232 = vmatpush.msra.mxu3 %v1203_v5 }
 0x34a   : > { %v1109_v15 = vmul.f32 0.5, %v1108_v14 }
 0x34b   : > { %1233 = vmatpush.msra.mxu3 %v1202_v6  ;;  %v1876_v6 = vld [vmem:[%s2631_s12] ss:$0 sm:$0xff] }
 0x34c   : > { %v1110_v16 = vsub.f32 1.5, %v1109_v15 }
 0x34d   : > { %1234 = vmatpush.msra.mxu3 %v1201_v7 }
 0x34e   : > { %v1892_v17 = vpop.eup %1891  ;;  %v1111_v19 = vmul.f32 %v1890_v11, %v1110_v16 }
 0x34f   : > { %v1117_v21 = vmul.f32 %v1892_v17, %v1105_v13  ;;  %vm1123_vm11 = vweird.f32 %v1892_v17  ;;  %1235 = vmatpush.msra.mxu3 %v1200_v8 }
 0x350   : > { %v1115_v24 = vsel %vm1114_vm10, %v1890_v11, %v1111_v19  ;;  %vm1124_vm13 = vmor %vm1122_vm12, %vm1123_vm11  ;;  %v1197_v11 = vld [vmem:[%s2629_s10 + $0x8] sm:$0xff] }
 0x351   : > { %v1126_v25 = vmul.f32 %v1115_v24, %v1102_v20  ;;  %v1118_v26 = vmul.f32 %v1892_v17, %v1117_v21  ;;  %1236 = vmatpush.msra.mxu3 %v1199_v9 }
 0x353   : > { %v1132_v29 = vmul.f32 %v1873_v18, %v1126_v25  ;;  %v1119_v30 = vmul.f32 0.5, %v1118_v26  ;;  %1237 = vmatpush.msra.mxu3 %v1198_v10  ;;  %v1875_v25 = vld [vmem:[%s2630_s11] ss:$0 sm:$0xff] }
 0x355   : > { %v1120_v31 = vsub.f32 1.5, %v1119_v30  ;;  %v1138_v32 = vadd.f32 %v1874_v28, %v1132_v29  ;;  %1238 = vmatpush.msra.mxu3 %v1197_v11  ;;  %v1877_v11 = vld [vmem:[%s2632_s13] ss:$0 sm:$0xff] }
 0x357   : > { %v1121_v33 = vmul.f32 %v1892_v17, %v1120_v31  ;;  %v1142_v37 = vrot.slane %v1138_v32, 6  ;;  %1239 = vmatpush.msra.mxu3 %v1196_v12 }
 0x359   : > { %v1125_v35 = vsel %vm1124_vm13, %v1892_v17, %v1121_v33  ;;  %v1148_v40 = vsel %vm766_vm0, 0.0, %v1142_v37 }
 0x35a   : > { %v1127_v36 = vmul.f32 %v1125_v35, %v1103_v34  ;;  %v1185_v42 = vrot.slane %v1148_v40, 4  ;;  %v1174_v44 = vrot.slane %v1148_v40, 3  ;;  %v1163_v45 = vrot.slane %v1148_v40, 2 }
 0x35b   : > { %v1152_v46 = vrot.slane %v1148_v40, 1 }
 0x35c   : > { %v1133_v38 = vmul.f32 %v1873_v18, %v1127_v36 }
 0x35e   : > { %v1139_v39 = vadd.f32 %v1874_v28, %v1133_v38 }
 0x360   : > { %v1143_v41 = vrot.slane %v1139_v39, 6 }
 0x362   : > { %v2277_v43 = vsel %vm766_vm0, %v1142_v37, %v1143_v41  ;;  %v1149_v55 = vsel %vm766_vm0, %v1143_v41, 0.0 }
 0x363   : > { %v1186_v47 = vrot.slane %v2277_v43, 4  ;;  %v1175_v48 = vrot.slane %v2277_v43, 3  ;;  %v1164_v49 = vrot.slane %v2277_v43, 2  ;;  %v1153_v50 = vrot.slane %v2277_v43, 1 }
 0x364   : > { %v1188_v56 = vrot.slane %v1149_v55, 4  ;;  %v1166_v57 = vrot.slane %v1149_v55, 2  ;;  %v1177_v58 = vrot.slane %v1149_v55, 3  ;;  %v1155_v59 = vrot.slane %v1149_v55, 1 }
 0x365   : > { %v1187_v51 = vsel %vm813_vm4, %v1185_v42, %v1186_v47  ;;  %v1176_v52 = vsel %vm801_vm2, %v1174_v44, %v1175_v48  ;;  %v1165_v53 = vsel %vm789_vm3, %v1163_v45, %v1164_v49  ;;  %v1154_v54 = vsel %vm777_vm1, %v1152_v46, %v1153_v50 }
 0x366   : > { %1843 = vmatmul.msk.f32.vlgmr.msrb.gmra.mxu2 %vm828_vm6, %v1187_v51  ;;  %1179 = vrot.lane.b32.xlu0 %v1176_v52, %s2651_s1  ;;  %v1189_v60 = vsel %vm813_vm4, %v1186_v47, %v1188_v56  ;;  %v1167_v61 = vsel %vm789_vm3, %v1164_v49, %v1166_v57  ;;  %v1178_v62 = vsel %vm801_vm2, %v1175_v48, %v1177_v58  ;;  %v1408_v56 = vld [vmem:[%s2633_s14 + $0x90] sm:$0xff]  ;;  %v1407_v57 = vld [vmem:[%s2633_s14 + $0x88] sm:$0xff] }
 0x367   : > { %1168 = vrot.lane.b32.xlu1 %v1165_v53, %s2649_s7  ;;  %1157 = vrot.lane.b32.xlu2 %v1154_v54, %s2672_s0  ;;  %v1156_v63 = vsel %vm777_vm1, %v1153_v50, %v1155_v59  ;;  %v1409_v53 = vld [vmem:[%s2633_s14 + $0x98] sm:$0xff]  ;;  %v1406_v59 = vld [vmem:[%s2633_s14 + $0x80] sm:$0xff] }
 0x368   : > { %1453 = vmatpush.msra.mxu2 %v1409_v53  ;;  %v1399_v53 = vld [vmem:[%s2633_s14 + $0x48] sm:$0xff] }
 0x36a   : > { %1454 = vmatpush.msra.mxu2 %v1408_v56  ;;  %v1396_v56 = vld [vmem:[%s2633_s14 + $0x30] sm:$0xff] }
 0x36c   : > { %1455 = vmatpush.msra.mxu2 %v1407_v57  ;;  %v1395_v57 = vld [vmem:[%s2633_s14 + $0x28] sm:$0xff] }
 0x36e   : > { %1844 = vmatmul.msk.f32.gmra.mxu2 %vm828_vm6, %v1189_v60  ;;  %1170 = vrot.lane.b32.xlu0 %v1167_v61, %s2649_s7 }
 0x36f   : > { %1181 = vrot.lane.b32.xlu1 %v1178_v62, %s2651_s1  ;;  %1159 = vrot.lane.b32.xlu2 %v1156_v63, %s2672_s0 }
 0x370   : > { %1456 = vmatpush.msra.mxu2 %v1406_v59  ;;  %v1393_v59 = vld [vmem:[%s2633_s14 + $0x18] sm:$0xff] }
 0x3c1   : > { %v1158_v13 = vpop.permute.xlu2 %1157 }
 0x3c2   : > { %v1190_v15 = vsel %vm828_vm6, %v1148_v40, %v1158_v13 }
 0x3c9   : > { %v1160_v19 = vpop.permute.xlu2 %1159 }
 0x3ca   : > { %v1191_v20 = vsel %vm828_vm6, %v2277_v43, %v1160_v19 }
 0x3d8   : > { %v1180_v14 = vpop.permute.xlu0 %1179 }
 0x3d9   : > { %v1169_v16 = vpop.permute.xlu1 %1168 }
 0x3da   : > { %v1192_v17 = vsel %vm834_vm8, %v1190_v15, %v1169_v16 }
 0x3db   : > { %v1194_v18 = vsel %vm999_vm5, %v1192_v17, %v1180_v14  ;;  %v1405_v17 = vld [vmem:[%s2633_s14 + $0x78] sm:$0xff] }
 0x3dc   : > { %1240 = vmatmul.f32.vlgmr.msra.gmra.mxu3 %v1194_v18  ;;  %v1404_v18 = vld [vmem:[%s2633_s14 + $0x70] sm:$0xff]  ;;  %1418 = vmatpush.msrb.mxu0 %v1405_v17 }
 0x3de   : > { %1419 = vmatpush.msrb.mxu0 %v1404_v18 }
 0x3e0   : > { %v1171_v21 = vpop.permute.xlu0 %1170 }
 0x3e1   : > { %v1193_v22 = vsel %vm834_vm8, %v1191_v20, %v1171_v21  ;;  %v1182_v23 = vpop.permute.xlu1 %1181 }
 0x3e2   : > { %v1195_v24 = vsel %vm999_vm5, %v1193_v22, %v1182_v23 }
 0x3e4   : > { %1243 = vmatmul.f32.gmra.mxu3 %v1195_v24 }
 0x3e9   : > { %v1264_v26 = vpop.f32.mrf.mxu2 }
 0x3f1   : > { %v1267_v36 = vpop.f32.mrf.mxu2 }
 0x45f   : > { %v1241_v27 = vpop.f32.mrf.mxu3 }
 0x460   : > { %v1242_v28 = vadd.f32 %v1875_v25, %v1241_v27 }
 0x462   : > { %v1265_v29 = vadd.f32 %v1264_v26, %v1242_v28 }
 0x464   : > { %v1270_v30 = vmax.f32 %v1265_v29, 0.0 }
 0x466   : > { %v1272_v31 = vsel %vm828_vm6, %v1270_v30, 0.0  ;;  %v1278_v32 = vmul.f32 %v1270_v30, %v1270_v30 }
 0x467   : > { %1273 = vadd.xlane.f32.xlu2 %v1272_v31  ;;  %v1244_v33 = vpop.f32.mrf.mxu3 }
 0x468   : > { %v1245_v34 = vadd.f32 %v1875_v25, %v1244_v33  ;;  %v1280_v35 = vsel %vm828_vm6, %v1278_v32, 0.0 }
 0x469   : > { %1281 = vadd.xlane.f32.xlu1 %v1280_v35 }
 0x46a   : > { %v1268_v37 = vadd.f32 %v1267_v36, %v1245_v34 }
 0x46c   : > { %v2351_v38 = vmax.f32 %v1268_v37, 0.0 }
 0x46e   : > { %v1275_v39 = vsel %vm828_vm6, %v2351_v38, 0.0  ;;  %v1279_v40 = vmul.f32 %v2351_v38, %v2351_v38 }
 0x46f   : > { %1276 = vadd.xlane.f32.xlu0 %v1275_v39 }
 0x470   : > { %v1283_v41 = vsel %vm828_vm6, %v1279_v40, 0.0 }
 0x471   : > { %1284 = vadd.xlane.f32.xlu2 %v1283_v41 }
 0x4da   : > { %v1274_v42 = vpop.xlane.xlu2 %1273 }
 0x4db   : > { %v1286_v43 = vmul.f32 0.03125, %v1274_v42 }
 0x4dc   : > { %v1282_v44 = vpop.xlane.xlu1 %1281 }
 0x4dd   : > { %v1290_v45 = vmul.f32 %v1286_v43, %v1286_v43  ;;  %v1288_v46 = vmul.f32 0.03125, %v1282_v44  ;;  %v1296_v5 = vsub.f32 %v1270_v30, %v1286_v43 }
 0x4df   : > { %v1292_v47 = vsub.f32 %v1288_v46, %v1290_v45 }
 0x4e1   : > { %v1294_v48 = vmax.f32 %v1292_v47, 0.0 }
 0x4e2   : > { %v1277_v49 = vpop.xlane.xlu0 %1276 }
 0x4e3   : > { %v1298_v50 = vadd.f32 1e-12, %v1294_v48  ;;  %v1287_v51 = vmul.f32 0.03125, %v1277_v49  ;;  %v1403_v49 = vld [vmem:[%s2633_s14 + $0x68] sm:$0xff] }
 0x4e4   : > { %v1285_v52 = vpop.xlane.xlu2 %1284  ;;  %1420 = vmatpush.msrb.mxu0 %v1403_v49 }
 0x4e5   : > { %1893 = vrsqrt.f32 %v1298_v50  ;;  %v1291_v54 = vmul.f32 %v1287_v51, %v1287_v51  ;;  %v1289_v55 = vmul.f32 0.03125, %v1285_v52  ;;  %vm1306_vm15 = vweird.f32 %v1298_v50  ;;  %v1400_v52 = vld [vmem:[%s2633_s14 + $0x50] sm:$0xff] }
 0x4e6   : > { %v1297_v19 = vsub.f32 %v2351_v38, %v1287_v51  ;;  %v1401_v51 = vld [vmem:[%s2633_s14 + $0x58] sm:$0xff] }
 0x4e7   : > { %v1293_v58 = vsub.f32 %v1289_v55, %v1291_v54  ;;  %v1398_v54 = vld [vmem:[%s2633_s14 + $0x40] sm:$0xff]  ;;  %v1397_v55 = vld [vmem:[%s2633_s14 + $0x38] sm:$0xff] }
 0x4e9   : > { %v1295_v60 = vmax.f32 %v1293_v58, 0.0  ;;  %v1394_v58 = vld [vmem:[%s2633_s14 + $0x20] sm:$0xff] }
 0x4eb   : > { %v1894_v61 = vpop.eup %1893  ;;  %v1299_v63 = vadd.f32 1e-12, %v1295_v60  ;;  %v1392_v60 = vld [vmem:[%s2633_s14 + $0x10] sm:$0xff] }
 0x4ec   : > { %v1301_v62 = vmul.f32 %v1894_v61, %v1298_v50  ;;  %vm1307_vm14 = vweird.f32 %v1894_v61  ;;  %v1402_v50 = vld [vmem:[%s2633_s14 + $0x60] sm:$0xff] }
 0x4ed   : > { %1895 = vrsqrt.f32 %v1299_v63  ;;  %vm1308_vm7 = vmor %vm1306_vm15, %vm1307_vm14  ;;  %vm1316_vm10 = vweird.f32 %v1299_v63  ;;  %1421 = vmatpush.msrb.mxu0 %v1402_v50 }
 0x4ee   : > { %v1302_v0 = vmul.f32 %v1894_v61, %v1301_v62  ;;  %v1390_v62 = vld [vmem:[%s2633_s14] sm:$0xff] }
 0x4ef   : > { %1422 = vmatpush.msrb.mxu0 %v1401_v51 }
 0x4f0   : > { %v1303_v1 = vmul.f32 0.5, %v1302_v0 }
 0x4f1   : > { %1423 = vmatpush.msrb.mxu0 %v1400_v52 }
 0x4f2   : > { %v1304_v2 = vsub.f32 1.5, %v1303_v1 }
 0x4f3   : > { %v1896_v3 = vpop.eup %1895  ;;  %1424 = vmatpush.msrb.mxu0 %v1399_v53 }
 0x4f4   : > { %v1305_v4 = vmul.f32 %v1894_v61, %v1304_v2  ;;  %v1311_v7 = vmul.f32 %v1896_v3, %v1299_v63  ;;  %vm1317_vm9 = vweird.f32 %v1896_v3 }
 0x4f5   : > { %vm1318_vm11 = vmor %vm1316_vm10, %vm1317_vm9  ;;  %1425 = vmatpush.msrb.mxu0 %v1398_v54 }
 0x4f6   : > { %v1309_v8 = vsel %vm1308_vm7, %v1894_v61, %v1305_v4  ;;  %v1312_v10 = vmul.f32 %v1896_v3, %v1311_v7  ;;  %v1391_v61 = vld [vmem:[%s2633_s14 + $0x8] sm:$0xff] }
 0x4f7   : > { %v1320_v9 = vmul.f32 %v1309_v8, %v1296_v5  ;;  %1426 = vmatpush.msrb.mxu0 %v1397_v55 }
 0x4f8   : > { %v1313_v13 = vmul.f32 0.5, %v1312_v10 }
 0x4f9   : > { %v1326_v12 = vmul.f32 %v1876_v6, %v1320_v9  ;;  %1427 = vmatpush.msrb.mxu0 %v1396_v56 }
 0x4fa   : > { %v1314_v14 = vsub.f32 1.5, %v1313_v13 }
 0x4fb   : > { %v1332_v15 = vadd.f32 %v1877_v11, %v1326_v12  ;;  %1428 = vmatpush.msrb.mxu0 %v1395_v57  ;;  %v1879_v57 = vld [vmem:[%s2635_s16] ss:$0 sm:$0xff] }
 0x4fc   : > { %v1315_v16 = vmul.f32 %v1896_v3, %v1314_v14 }
 0x4fd   : > { %v1336_v21 = vrot.slane %v1332_v15, 6  ;;  %1429 = vmatpush.msrb.mxu0 %v1394_v58 }
 0x4fe   : > { %v1319_v20 = vsel %vm1318_vm11, %v1896_v3, %v1315_v16 }
 0x4ff   : > { %v1321_v22 = vmul.f32 %v1319_v20, %v1297_v19  ;;  %v2384_v25 = vsel %vm766_vm0, 0.0, %v1336_v21  ;;  %1430 = vmatpush.msrb.mxu0 %v1393_v59 }
 0x500   : > { %v1379_v27 = vrot.slane %v2384_v25, 4  ;;  %v1368_v29 = vrot.slane %v2384_v25, 3  ;;  %v1357_v30 = vrot.slane %v2384_v25, 2  ;;  %v1346_v31 = vrot.slane %v2384_v25, 1 }
 0x501   : > { %v1327_v23 = vmul.f32 %v1876_v6, %v1321_v22  ;;  %1431 = vmatpush.msrb.mxu0 %v1392_v60  ;;  %v1599_v60 = vld [vmem:[%s2637_s18 + $0x78] sm:$0xff] }
 0x502   : > { %1612 = vmatpush.msrb.mxu1 %v1599_v60 }
 0x503   : > { %v1333_v24 = vadd.f32 %v1877_v11, %v1327_v23  ;;  %1432 = vmatpush.msrb.mxu0 %v1391_v61  ;;  %v1878_v11 = vld [vmem:[%s2634_s15] ss:$0 sm:$0xff]  ;;  %v1598_v61 = vld [vmem:[%s2637_s18 + $0x70] sm:$0xff] }
 0x504   : > { %1613 = vmatpush.msrb.mxu1 %v1598_v61  ;;  %v1881_v61 = vld [vmem:[%s2638_s19] ss:$0 sm:$0xff] }
 0x505   : > { %v1337_v26 = vrot.slane %v1333_v24, 6  ;;  %1433 = vmatpush.msrb.mxu0 %v1390_v62 }
 0x507   : > { %v2388_v28 = vsel %vm766_vm0, %v1336_v21, %v1337_v26  ;;  %v1343_v40 = vsel %vm766_vm0, %v1337_v26, 0.0 }
 0x508   : > { %v1380_v32 = vrot.slane %v2388_v28, 4  ;;  %v1369_v33 = vrot.slane %v2388_v28, 3  ;;  %v1358_v34 = vrot.slane %v2388_v28, 2  ;;  %v1347_v35 = vrot.slane %v2388_v28, 1 }
 0x509   : > { %v1382_v41 = vrot.slane %v1343_v40, 4  ;;  %v1360_v42 = vrot.slane %v1343_v40, 2  ;;  %v1349_v43 = vrot.slane %v1343_v40, 1  ;;  %v1371_v47 = vrot.slane %v1343_v40, 3 }
 0x50a   : > { %v1381_v36 = vsel %vm813_vm4, %v1379_v27, %v1380_v32  ;;  %v1370_v37 = vsel %vm801_vm2, %v1368_v29, %v1369_v33  ;;  %v1359_v38 = vsel %vm789_vm3, %v1357_v30, %v1358_v34  ;;  %v1348_v39 = vsel %vm777_vm1, %v1346_v31, %v1347_v35 }
 0x50b   : > { %1845 = vmatmul.msk.f32.vlgmr.msra.gmra.mxu2 %vm828_vm6, %v1381_v36  ;;  %1373 = vrot.lane.b32.xlu2 %v1370_v37, %s2651_s1  ;;  %v1383_v44 = vsel %vm813_vm4, %v1380_v32, %v1382_v41  ;;  %v1361_v45 = vsel %vm789_vm3, %v1358_v34, %v1360_v42  ;;  %v1350_v46 = vsel %vm777_vm1, %v1347_v35, %v1349_v43  ;;  %v1602_v43 = vld [vmem:[%s2637_s18 + $0x90] sm:$0xff] }
 0x50c   : > { %1362 = vrot.lane.b32.xlu1 %v1359_v38, %s2673_s5  ;;  %1351 = vrot.lane.b32.xlu0 %v1348_v39, %s2672_s0  ;;  %v1372_v48 = vsel %vm801_vm2, %v1369_v33, %v1371_v47  ;;  %v1603_v39 = vld [vmem:[%s2637_s18 + $0x98] sm:$0xff] }
 0x50d   : > { %1647 = vmatpush.msrb.mxu3 %v1603_v39  ;;  %v1593_v39 = vld [vmem:[%s2637_s18 + $0x48] sm:$0xff] }
 0x50f   : > { %1648 = vmatpush.msrb.mxu3 %v1602_v43  ;;  %v1589_v43 = vld [vmem:[%s2637_s18 + $0x28] sm:$0xff] }
 0x513   : > { %1846 = vmatmul.msk.f32.gmra.mxu2 %vm828_vm6, %v1383_v44 }
 0x514   : > { %1364 = vrot.lane.b32.xlu1 %v1361_v45, %s2673_s5  ;;  %1353 = vrot.lane.b32.xlu0 %v1350_v46, %s2672_s0  ;;  %v1601_v45 = vld [vmem:[%s2637_s18 + $0x88] sm:$0xff] }
 0x515   : > { %1649 = vmatpush.msrb.mxu3 %v1601_v45  ;;  %v1587_v45 = vld [vmem:[%s2637_s18 + $0x18] sm:$0xff] }
 0x51c   : > { %1375 = vrot.lane.b32.xlu0 %v1372_v48, %s2651_s1  ;;  %v1600_v48 = vld [vmem:[%s2637_s18 + $0x80] sm:$0xff] }
 0x51d   : > { %1650 = vmatpush.msrb.mxu3 %v1600_v48  ;;  %v1584_v48 = vld [vmem:[%s2637_s18] sm:$0xff] }
 0x565   : > { %v1374_v2 = vpop.permute.xlu2 %1373 }
 0x57e   : > { %v1363_v63 = vpop.permute.xlu1 %1362  ;;  %v1352_v0 = vpop.permute.xlu0 %1351 }
 0x57f   : > { %v1384_v1 = vsel %vm828_vm6, %v2384_v25, %v1352_v0 }
 0x580   : > { %v1386_v3 = vsel %vm834_vm8, %v1384_v1, %v1363_v63  ;;  %v1880_v63 = vld [vmem:[%s2636_s17] ss:$0 sm:$0xff] }
 0x581   : > { %v1388_v4 = vsel %vm999_vm5, %v1386_v3, %v1374_v2 }
 0x582   : > { %1434 = vmatmul.f32.vlgmr.msrb.gmra.mxu0 %v1388_v4 }
 0x586   : > { %v1354_v5 = vpop.permute.xlu0 %1353  ;;  %v1365_v6 = vpop.permute.xlu1 %1364 }
 0x587   : > { %v1385_v7 = vsel %vm828_vm6, %v2388_v28, %v1354_v5 }
 0x588   : > { %v1387_v9 = vsel %vm834_vm8, %v1385_v7, %v1365_v6 }
 0x58e   : > { %v1376_v8 = vpop.permute.xlu0 %1375  ;;  %v1458_v14 = vpop.f32.mrf.mxu2 }
 0x58f   : > { %v1389_v10 = vsel %vm999_vm5, %v1387_v9, %v1376_v8 }
 0x590   : > { %1437 = vmatmul.f32.gmra.mxu0 %v1389_v10 }
 0x596   : > { %v1461_v22 = vpop.f32.mrf.mxu2 }
 0x5ff   : > { %v1435_v12 = vpop.f32.mrf.mxu0 }
 0x600   : > { %v1436_v13 = vadd.f32 %v1878_v11, %v1435_v12 }
 0x602   : > { %v1459_v15 = vadd.f32 %v1458_v14, %v1436_v13 }
 0x604   : > { %v1464_v16 = vmax.f32 %v1459_v15, 0.0 }
 0x606   : > { %v1466_v17 = vsel %vm828_vm6, %v1464_v16, 0.0  ;;  %v1472_v18 = vmul.f32 %v1464_v16, %v1464_v16 }
 0x607   : > { %1467 = vadd.xlane.f32.xlu2 %v1466_v17 }
 0x608   : > { %v1474_v19 = vsel %vm828_vm6, %v1472_v18, 0.0 }
 0x609   : > { %1475 = vadd.xlane.f32.xlu0 %v1474_v19 }
 0x60d   : > { %v1438_v20 = vpop.f32.mrf.mxu0 }
 0x60e   : > { %v1439_v21 = vadd.f32 %v1878_v11, %v1438_v20 }
 0x610   : > { %v1462_v23 = vadd.f32 %v1461_v22, %v1439_v21 }
 0x612   : > { %v2469_v24 = vmax.f32 %v1462_v23, 0.0 }
 0x614   : > { %v1469_v25 = vsel %vm828_vm6, %v2469_v24, 0.0  ;;  %v1473_v26 = vmul.f32 %v2469_v24, %v2469_v24 }
 0x615   : > { %1470 = vadd.xlane.f32.xlu1 %v1469_v25 }
 0x616   : > { %v1477_v27 = vsel %vm828_vm6, %v1473_v26, 0.0 }
 0x617   : > { %1478 = vadd.xlane.f32.xlu2 %v1477_v27 }
 0x67a   : > { %v1468_v28 = vpop.xlane.xlu2 %1467 }
 0x67b   : > { %v1480_v29 = vmul.f32 0.03125, %v1468_v28 }
 0x67c   : > { %v1476_v30 = vpop.xlane.xlu0 %1475 }
 0x67d   : > { %v1484_v31 = vmul.f32 %v1480_v29, %v1480_v29  ;;  %v1482_v32 = vmul.f32 0.03125, %v1476_v30  ;;  %v1490_v55 = vsub.f32 %v1464_v16, %v1480_v29 }
 0x67f   : > { %v1486_v33 = vsub.f32 %v1482_v32, %v1484_v31 }
 0x681   : > { %v1488_v34 = vmax.f32 %v1486_v33, 0.0 }
 0x683   : > { %v1492_v35 = vadd.f32 1e-12, %v1488_v34 }
 0x685   : > { %1897 = vrsqrt.f32 %v1492_v35  ;;  %vm1500_vm13 = vweird.f32 %v1492_v35 }
 0x688   : > { %v1471_v36 = vpop.xlane.xlu1 %1470 }
 0x689   : > { %v1481_v37 = vmul.f32 0.03125, %v1471_v36  ;;  %v1596_v36 = vld [vmem:[%s2637_s18 + $0x60] sm:$0xff] }
 0x68a   : > { %v1479_v38 = vpop.xlane.xlu2 %1478 }
 0x68b   : > { %v1898_v40 = vpop.eup %1897  ;;  %v1485_v41 = vmul.f32 %v1481_v37, %v1481_v37  ;;  %v1483_v42 = vmul.f32 0.03125, %v1479_v38  ;;  %v1491_v5 = vsub.f32 %v2469_v24, %v1481_v37  ;;  %v1595_v37 = vld [vmem:[%s2637_s18 + $0x58] sm:$0xff]  ;;  %v1594_v38 = vld [vmem:[%s2637_s18 + $0x50] sm:$0xff] }
 0x68c   : > { %v1495_v44 = vmul.f32 %v1898_v40, %v1492_v35  ;;  %vm1501_vm12 = vweird.f32 %v1898_v40  ;;  %v1597_v35 = vld [vmem:[%s2637_s18 + $0x68] sm:$0xff] }
 0x68d   : > { %v1487_v46 = vsub.f32 %v1483_v42, %v1485_v41  ;;  %vm1502_vm14 = vmor %vm1500_vm13, %vm1501_vm12  ;;  %1614 = vmatpush.msrb.mxu1 %v1597_v35  ;;  %v1591_v41 = vld [vmem:[%s2637_s18 + $0x38] sm:$0xff]  ;;  %v1590_v42 = vld [vmem:[%s2637_s18 + $0x30] sm:$0xff] }
 0x68e   : > { %v1496_v47 = vmul.f32 %v1898_v40, %v1495_v44  ;;  %v1588_v44 = vld [vmem:[%s2637_s18 + $0x20] sm:$0xff] }
 0x68f   : > { %v1489_v49 = vmax.f32 %v1487_v46, 0.0  ;;  %1615 = vmatpush.msrb.mxu1 %v1596_v36  ;;  %v1586_v46 = vld [vmem:[%s2637_s18 + $0x10] sm:$0xff] }
 0x690   : > { %v1497_v50 = vmul.f32 0.5, %v1496_v47  ;;  %v1585_v47 = vld [vmem:[%s2637_s18 + $0x8] sm:$0xff] }
 0x691   : > { %v1493_v51 = vadd.f32 1e-12, %v1489_v49  ;;  %1616 = vmatpush.msrb.mxu1 %v1595_v37 }
 0x692   : > { %v1498_v52 = vsub.f32 1.5, %v1497_v50 }
 0x693   : > { %1899 = vrsqrt.f32 %v1493_v51  ;;  %vm1510_vm7 = vweird.f32 %v1493_v51  ;;  %1617 = vmatpush.msrb.mxu1 %v1594_v38 }
 0x694   : > { %v1499_v53 = vmul.f32 %v1898_v40, %v1498_v52 }
 0x695   : > { %1618 = vmatpush.msrb.mxu1 %v1593_v39 }
 0x696   : > { %v1503_v54 = vsel %vm1502_vm14, %v1898_v40, %v1499_v53  ;;  %v1592_v40 = vld [vmem:[%s2637_s18 + $0x40] sm:$0xff] }
 0x697   : > { %v1514_v58 = vmul.f32 %v1503_v54, %v1490_v55  ;;  %1619 = vmatpush.msrb.mxu1 %v1592_v40 }
 0x699   : > { %v1900_v56 = vpop.eup %1899  ;;  %v1520_v0 = vmul.f32 %v1879_v57, %v1514_v58  ;;  %1620 = vmatpush.msrb.mxu1 %v1591_v41 }
 0x69a   : > { %v1505_v59 = vmul.f32 %v1900_v56, %v1493_v51  ;;  %vm1511_vm15 = vweird.f32 %v1900_v56 }
 0x69b   : > { %v1526_v3 = vadd.f32 %v1880_v63, %v1520_v0  ;;  %vm1512_vm9 = vmor %vm1510_vm7, %vm1511_vm15  ;;  %1621 = vmatpush.msrb.mxu1 %v1590_v42  ;;  %v1882_v42 = vld [vmem:[%s2639_s20] ss:$0 sm:$0xff] }
 0x69c   : > { %v1506_v62 = vmul.f32 %v1900_v56, %v1505_v59 }
 0x69d   : > { %v1530_v8 = vrot.slane %v1526_v3, 6  ;;  %1622 = vmatpush.msrb.mxu1 %v1589_v43 }
 0x69e   : > { %v1507_v1 = vmul.f32 0.5, %v1506_v62 }
 0x69f   : > { %v2502_v11 = vsel %vm766_vm0, 0.0, %v1530_v8  ;;  %1623 = vmatpush.msrb.mxu1 %v1588_v44 }
 0x6a0   : > { %v1508_v2 = vsub.f32 1.5, %v1507_v1  ;;  %v1573_v13 = vrot.slane %v2502_v11, 4  ;;  %v1562_v15 = vrot.slane %v2502_v11, 3  ;;  %v1551_v16 = vrot.slane %v2502_v11, 2 }
 0x6a1   : > { %v1540_v17 = vrot.slane %v2502_v11, 1  ;;  %1624 = vmatpush.msrb.mxu1 %v1587_v45 }
 0x6a2   : > { %v1509_v4 = vmul.f32 %v1900_v56, %v1508_v2 }
 0x6a3   : > { %1625 = vmatpush.msrb.mxu1 %v1586_v46 }
 0x6a4   : > { %v1513_v6 = vsel %vm1512_vm9, %v1900_v56, %v1509_v4 }
 0x6a5   : > { %v1515_v7 = vmul.f32 %v1513_v6, %v1491_v5  ;;  %1626 = vmatpush.msrb.mxu1 %v1585_v47  ;;  %v1883_v47 = vld [vmem:[%s2640_s21] ss:$0 sm:$0xff] }
 0x6a7   : > { %v1521_v9 = vmul.f32 %v1879_v57, %v1515_v7  ;;  %1627 = vmatpush.msrb.mxu1 %v1584_v48 }
 0x6a9   : > { %v1527_v10 = vadd.f32 %v1880_v63, %v1521_v9 }
 0x6ab   : > { %v1531_v12 = vrot.slane %v1527_v10, 6 }
 0x6ad   : > { %v2506_v14 = vsel %vm766_vm0, %v1530_v8, %v1531_v12  ;;  %v1537_v26 = vsel %vm766_vm0, %v1531_v12, 0.0 }
 0x6ae   : > { %v1574_v18 = vrot.slane %v2506_v14, 4  ;;  %v1563_v19 = vrot.slane %v2506_v14, 3  ;;  %v1552_v20 = vrot.slane %v2506_v14, 2  ;;  %v1541_v21 = vrot.slane %v2506_v14, 1 }
 0x6af   : > { %v1576_v27 = vrot.slane %v1537_v26, 4  ;;  %v1565_v28 = vrot.slane %v1537_v26, 3  ;;  %v1543_v29 = vrot.slane %v1537_v26, 1  ;;  %v1554_v30 = vrot.slane %v1537_v26, 2 }
 0x6b0   : > { %v1575_v22 = vsel %vm813_vm4, %v1573_v13, %v1574_v18  ;;  %v1564_v23 = vsel %vm801_vm2, %v1562_v15, %v1563_v19  ;;  %v1553_v24 = vsel %vm789_vm3, %v1551_v16, %v1552_v20  ;;  %v1542_v25 = vsel %vm777_vm1, %v1540_v17, %v1541_v21  ;;  %v1724_v15 = vld [vmem:[%s2641_s22 + $0x10] sm:$0xff]  ;;  %v1723_v17 = vld [vmem:[%s2641_s22 + $0x8] sm:$0xff] }
 0x6b1   : > { %1847 = vmatmul.msk.f32.vlgmr.msrb.gmra.mxu3 %vm828_vm6, %v1575_v22  ;;  %1567 = vrot.lane.b32.xlu2 %v1564_v23, %s2674_s27  ;;  %v1577_v31 = vsel %vm813_vm4, %v1574_v18, %v1576_v27  ;;  %v1566_v32 = vsel %vm801_vm2, %v1563_v19, %v1565_v28  ;;  %v1544_v33 = vsel %vm777_vm1, %v1541_v21, %v1543_v29 }
 0x6b2   : > { %1556 = vrot.lane.b32.xlu0 %v1553_v24, %s2673_s5  ;;  %1545 = vrot.lane.b32.xlu1 %v1542_v25, %s2672_s0  ;;  %v1555_v34 = vsel %vm789_vm3, %v1552_v20, %v1554_v30  ;;  %v1722_v20 = vld [vmem:[%s2641_s22] sm:$0xff] }
 0x6b9   : > { %1848 = vmatmul.msk.f32.gmra.mxu3 %vm828_vm6, %v1577_v31  ;;  %1569 = vrot.lane.b32.xlu2 %v1566_v32, %s2674_s27 }
 0x6ba   : > { %1547 = vrot.lane.b32.xlu0 %v1544_v33, %s2672_s0  ;;  %1558 = vrot.lane.b32.xlu1 %v1555_v34, %s2673_s5 }
 0x70b   : > { %v1568_v49 = vpop.permute.xlu2 %1567 }
 0x713   : > { %v1570_v58 = vpop.permute.xlu2 %1569 }
 0x724   : > { %v1557_v50 = vpop.permute.xlu0 %1556  ;;  %v1546_v51 = vpop.permute.xlu1 %1545 }
 0x725   : > { %v1578_v52 = vsel %vm828_vm6, %v2502_v11, %v1546_v51 }
 0x726   : > { %v1580_v53 = vsel %vm834_vm8, %v1578_v52, %v1557_v50 }
 0x727   : > { %v1582_v54 = vsel %vm999_vm5, %v1580_v53, %v1568_v49 }
 0x728   : > { %1628 = vmatmul.f32.vlgmr.msrb.gmra.mxu1 %v1582_v54 }
 0x72c   : > { %v1548_v55 = vpop.permute.xlu0 %1547  ;;  %v1559_v56 = vpop.permute.xlu1 %1558 }
 0x72d   : > { %v1579_v57 = vsel %vm828_vm6, %v2506_v14, %v1548_v55  ;;  %v1725_v14 = vld [vmem:[%s2641_s22 + $0x18] sm:$0xff] }
 0x72e   : > { %v1581_v59 = vsel %vm834_vm8, %v1579_v57, %v1559_v56  ;;  %1748 = vmatpush.msrb.mxu2 %v1725_v14 }
 0x72f   : > { %v1583_v60 = vsel %vm999_vm5, %v1581_v59, %v1570_v58  ;;  %v1884_v58 = vld [vmem:[%s2642_s23] ss:$0 sm:$0xff] }
 0x730   : > { %1631 = vmatmul.f32.gmra.mxu1 %v1583_v60  ;;  %1749 = vmatpush.msrb.mxu2 %v1724_v15 }
 0x732   : > { %1750 = vmatpush.msrb.mxu2 %v1723_v17 }
 0x734   : > { %v1652_v62 = vpop.f32.mrf.mxu3  ;;  %1751 = vmatpush.msrb.mxu2 %v1722_v20 }
 0x73c   : > { %v1655_v8 = vpop.f32.mrf.mxu3 }
 0x7a5   : > { %v1629_v63 = vpop.f32.mrf.mxu1 }
 0x7a6   : > { %v1630_v0 = vadd.f32 %v1881_v61, %v1629_v63 }
 0x7a8   : > { %v1653_v1 = vadd.f32 %v1652_v62, %v1630_v0 }
 0x7aa   : > { %v1658_v2 = vmax.f32 %v1653_v1, 0.0 }
 0x7ac   : > { %v1660_v3 = vsel %vm828_vm6, %v1658_v2, 0.0  ;;  %v1666_v4 = vmul.f32 %v1658_v2, %v1658_v2 }
 0x7ad   : > { %1661 = vadd.xlane.f32.xlu0 %v1660_v3  ;;  %v1632_v5 = vpop.f32.mrf.mxu1 }
 0x7ae   : > { %v1633_v6 = vadd.f32 %v1881_v61, %v1632_v5  ;;  %v1668_v7 = vsel %vm828_vm6, %v1666_v4, 0.0 }
 0x7af   : > { %1669 = vadd.xlane.f32.xlu1 %v1668_v7 }
 0x7b0   : > { %v1656_v9 = vadd.f32 %v1655_v8, %v1633_v6 }
 0x7b2   : > { %v1659_v10 = vmax.f32 %v1656_v9, 0.0 }
 0x7b4   : > { %v1663_v11 = vsel %vm828_vm6, %v1659_v10, 0.0  ;;  %v1667_v12 = vmul.f32 %v1659_v10, %v1659_v10 }
 0x7b5   : > { %1664 = vadd.xlane.f32.xlu2 %v1663_v11 }
 0x7b6   : > { %v1671_v13 = vsel %vm828_vm6, %v1667_v12, 0.0 }
 0x7b7   : > { %1672 = vadd.xlane.f32.xlu0 %v1671_v13 }
 0x820   : > { %v1662_v16 = vpop.xlane.xlu0 %1661 }
 0x821   : > { %v1674_v18 = vmul.f32 0.03125, %v1662_v16 }
 0x822   : > { %v1670_v19 = vpop.xlane.xlu1 %1669 }
 0x823   : > { %v1678_v21 = vmul.f32 %v1674_v18, %v1674_v18  ;;  %v1676_v22 = vmul.f32 0.03125, %v1670_v19  ;;  %v1684_v41 = vsub.f32 %v1658_v2, %v1674_v18 }
 0x825   : > { %v1680_v23 = vsub.f32 %v1676_v22, %v1678_v21 }
 0x827   : > { %v1682_v24 = vmax.f32 %v1680_v23, 0.0 }
 0x828   : > { %v1665_v25 = vpop.xlane.xlu2 %1664 }
 0x829   : > { %v1686_v26 = vadd.f32 1e-12, %v1682_v24  ;;  %v1675_v27 = vmul.f32 0.03125, %v1665_v25 }
 0x82a   : > { %v1673_v28 = vpop.xlane.xlu0 %1672 }
 0x82b   : > { %1901 = vrsqrt.f32 %v1686_v26  ;;  %v1679_v29 = vmul.f32 %v1675_v27, %v1675_v27  ;;  %v1677_v30 = vmul.f32 0.03125, %v1673_v28  ;;  %vm1694_vm1 = vweird.f32 %v1686_v26 }
 0x82c   : > { %v1685_v53 = vsub.f32 %v1659_v10, %v1675_v27 }
 0x82d   : > { %v1681_v31 = vsub.f32 %v1677_v30, %v1679_v29 }
 0x82f   : > { %v1683_v32 = vmax.f32 %v1681_v31, 0.0 }
 0x831   : > { %v1902_v33 = vpop.eup %1901  ;;  %v1687_v35 = vadd.f32 1e-12, %v1683_v32 }
 0x832   : > { %v1689_v34 = vmul.f32 %v1902_v33, %v1686_v26  ;;  %vm1695_vm0 = vweird.f32 %v1902_v33 }
 0x833   : > { %1903 = vrsqrt.f32 %v1687_v35  ;;  %vm1696_vm2 = vmor %vm1694_vm1, %vm1695_vm0  ;;  %vm1704_vm4 = vweird.f32 %v1687_v35 }
 0x834   : > { %v1690_v36 = vmul.f32 %v1902_v33, %v1689_v34 }
 0x836   : > { %v1691_v37 = vmul.f32 0.5, %v1690_v36 }
 0x838   : > { %v1692_v38 = vsub.f32 1.5, %v1691_v37 }
 0x839   : > { %v1904_v39 = vpop.eup %1903 }
 0x83a   : > { %v1693_v40 = vmul.f32 %v1902_v33, %v1692_v38  ;;  %v1699_v43 = vmul.f32 %v1904_v39, %v1687_v35  ;;  %vm1705_vm3 = vweird.f32 %v1904_v39 }
 0x83b   : > { %vm1706_vm8 = vmor %vm1704_vm4, %vm1705_vm3 }
 0x83c   : > { %v1697_v44 = vsel %vm1696_vm2, %v1902_v33, %v1693_v40  ;;  %v1700_v46 = vmul.f32 %v1904_v39, %v1699_v43 }
 0x83d   : > { %v1708_v45 = vmul.f32 %v1697_v44, %v1684_v41 }
 0x83e   : > { %v1701_v49 = vmul.f32 0.5, %v1700_v46 }
 0x83f   : > { %v1714_v48 = vmul.f32 %v1882_v42, %v1708_v45 }
 0x840   : > { %v1702_v50 = vsub.f32 1.5, %v1701_v49 }
 0x841   : > { %v1720_v51 = vadd.f32 %v1883_v47, %v1714_v48 }
 0x842   : > { %v1703_v52 = vmul.f32 %v1904_v39, %v1702_v50 }
 0x843   : > { %1849 = vmatmul.msk.f32.vlgmr.msrb.gmra.mxu2 %vm828_vm6, %v1720_v51 }
 0x844   : > { %v1707_v54 = vsel %vm1706_vm8, %v1904_v39, %v1703_v52 }
 0x845   : > { %v1709_v55 = vmul.f32 %v1707_v54, %v1685_v53 }
 0x847   : > { %v1715_v56 = vmul.f32 %v1882_v42, %v1709_v55 }
 0x849   : > { %v1721_v57 = vadd.f32 %v1883_v47, %v1715_v56 }
 0x84b   : > { %1850 = vmatmul.msk.f32.gmra.mxu2 %vm828_vm6, %v1721_v57 }
 0x8c6   : > { %v1753_v59 = vpop.f32.mrf.mxu2 }
 0x8c7   : > { %v1754_v60 = vadd.f32 %v1884_v58, %v1753_v59 }
 0x8c9   : > { %1759 = vst [vmem:[%s757_s4] sm:$0xff] %v1754_v60 }
 0x8ce   : > { %v1756_v61 = vpop.f32.mrf.mxu2 }
 0x8cf   : > { %v1757_v62 = vadd.f32 %v1884_v58, %v1756_v61 }
 0x8d1   : > { %1760 = vst [vmem:[%s757_s4 + $0x8] sm:$0xff] %v1757_v62 }
 0x8d2 PF: > { %s2675_s27 = sld [smem:[#allocation2_spill]] }
 0x8d8   : > { %s34_s5 = sadd.s32 1, %s2675_s27  }
 0x8d9   : > { %p31_p4 = scmp.ge.s32.totalorder %s34_s5, 4  }
 0x8db   :  { %33 = sbr.rel (!%p31_p4) target bundleno = 10 (0xa), region = 149 }

</bundles_post_ra>
